<compile_context>
chip_gen: v7x
topology: tpu7x:2x2x1
jax: 0.10.0
libtpu: 0.0.40
codegen_flags: <defaults>
</compile_context>

<pallas_src>
import jax
import jax.numpy as jnp
from jax import lax
from jax.experimental import pallas as pl
from jax.experimental.pallas import tpu as pltpu

# Model constants (from the PyTorch module)
D_MODEL = 256
D_Q = 64
D_V = 64
D_FF = 256
N_HEAD = 1          # single head
LN_EPS = 1e-5       # nn.LayerNorm default


def _layernorm(x):
    # PyTorch LayerNorm over last dim, fresh module => weight=1, bias=0,
    # eps=1e-5, biased variance.
    mu = jnp.mean(x, axis=-1, keepdims=True)
    xc = x - mu
    var = jnp.mean(xc * xc, axis=-1, keepdims=True)
    return xc * lax.rsqrt(var + LN_EPS)


def _masked_attention(q, k, v, mask_bool):
    # q: (Bt, Sq, D_Q)   k, v: (Bt, Sk, D_Q / D_V)   mask_bool: (Bt, Sq, Sk)
    inv_sqrt_dq = 1.0 / float(D_Q) ** 0.5
    score = jnp.einsum("bqd,bkd->bqk", q, k,
                       preferred_element_type=jnp.float32) * inv_sqrt_dq
    score = jnp.where(mask_bool, jnp.float32(-1e9), score)
    score = score - jnp.max(score, axis=-1, keepdims=True)
    e = jnp.exp(score)
    inv = pl.reciprocal(jnp.sum(e, axis=-1, keepdims=True), approx=True)
    attn = e * inv
    attn = jnp.where(mask_bool, jnp.float32(0.0), attn)
    return jnp.einsum("bqk,bkd->bqd", attn, v,
                      preferred_element_type=jnp.float32)


def _decoder_layer_kernel(dec_ref, enc_ref, smask_ref, cmask_ref,
                          wqkv_s_ref, wfc_s_ref,
                          wq_c_ref, wkv_c_ref, wfc_c_ref,
                          w1_ref, w2_ref, out_ref):
    # dec_ref:  (Bt, S_dec, D_MODEL)      enc_ref:  (Bt, S_enc, D_MODEL)
    # smask:    (Bt, S_dec, S_dec) int8   cmask:    (Bt, S_dec, S_enc) int8
    # wqkv_s:   (D_MODEL, 3*D_Q) bf16     wfc_s:    (D_V, D_MODEL) bf16
    # wq_c:     (D_MODEL, D_Q)   bf16     wkv_c:    (D_MODEL, 2*D_Q) bf16
    # wfc_c:    (D_V, D_MODEL)   bf16     w1/w2:    (D_MODEL,D_FF)/(D_FF,D_MODEL) bf16
    Bt, S_dec, _ = dec_ref.shape
    S_enc = enc_ref.shape[1]
    Md = Bt * S_dec
    Me = Bt * S_enc
    bf16 = jnp.bfloat16

    dec = dec_ref[...].astype(jnp.float32).reshape(Md, D_MODEL)

    # ---------------- self attention ----------------
    qkv = jnp.dot(dec.astype(bf16), wqkv_s_ref[...],
                  preferred_element_type=jnp.float32)            # (Md, 192)
    q = qkv[:, :D_Q].reshape(Bt, S_dec, D_Q)
    k = qkv[:, D_Q:2 * D_Q].reshape(Bt, S_dec, D_Q)
    v = qkv[:, 2 * D_Q:].reshape(Bt, S_dec, D_V)
    sm = smask_ref[...] != 0
    ctx = _masked_attention(q, k, v, sm).reshape(Md, D_V)
    proj = jnp.dot(ctx.astype(bf16), wfc_s_ref[...],
                   preferred_element_type=jnp.float32)
    dec1 = _layernorm(proj + dec)                                # (Md, D_MODEL)

    # ---------------- cross attention ----------------
    enc = enc_ref[...].astype(jnp.float32).reshape(Me, D_MODEL)
    q2 = jnp.dot(dec1.astype(bf16), wq_c_ref[...],
                 preferred_element_type=jnp.float32).reshape(Bt, S_dec, D_Q)
    kv2 = jnp.dot(enc.astype(bf16), wkv_c_ref[...],
                  preferred_element_type=jnp.float32)            # (Me, 128)
    k2 = kv2[:, :D_Q].reshape(Bt, S_enc, D_Q)
    v2 = kv2[:, D_Q:].reshape(Bt, S_enc, D_V)
    cm = cmask_ref[...] != 0
    ctx2 = _masked_attention(q2, k2, v2, cm).reshape(Md, D_V)
    proj2 = jnp.dot(ctx2.astype(bf16), wfc_c_ref[...],
                    preferred_element_type=jnp.float32)
    dec2 = _layernorm(proj2 + dec1)

    # ---------------- position-wise FFN ----------------
    h = jnp.maximum(jnp.dot(dec2.astype(bf16), w1_ref[...],
                            preferred_element_type=jnp.float32), 0.0)
    ff = jnp.dot(h.astype(bf16), w2_ref[...],
                 preferred_element_type=jnp.float32)
    out = _layernorm(ff + dec2)
    out_ref[...] = out.reshape(Bt, S_dec, D_MODEL).astype(out_ref.dtype)


def _pick_bt(batch, seq):
    """Batch-block size so that Bt*seq rows roughly fill the MXU M dimension."""
    bt = min(batch, max(1, -(-128 // seq)))   # ceil(128/seq), capped at batch
    while batch % bt:
        bt -= 1
    return bt


@jax.jit
def decoder_layer(dec, enc, self_mask, cross_mask,
                  wq_s, wk_s, wv_s, wfc_s,
                  wq_c, wk_c, wv_c, wfc_c,
                  w1, w2):
    B, S_dec, _ = dec.shape
    S_enc = enc.shape[1]
    Bt = _pick_bt(B, S_dec)

    bf16 = jnp.bfloat16
    # Fuse projections into single lane-dense weight matrices, cast to bf16.
    wqkv_s = jnp.concatenate([wq_s, wk_s, wv_s], axis=1).astype(bf16)  # (256,192)
    wkv_c = jnp.concatenate([wk_c, wv_c], axis=1).astype(bf16)         # (256,128)
    wq_c_b = wq_c.astype(bf16)
    wfc_s_b = wfc_s.astype(bf16)
    wfc_c_b = wfc_c.astype(bf16)
    w1_b = w1.astype(bf16)
    w2_b = w2.astype(bf16)

    # Masks: nonzero == masked; ship as int8 (4x less HBM/VMEM than f32).
    sm = (self_mask != 0).astype(jnp.int8)
    cm = (cross_mask != 0).astype(jnp.int8)

    const2 = lambda b: (0, 0)
    grid_spec = pltpu.PrefetchScalarGridSpec(
        num_scalar_prefetch=0,
        grid=(B // Bt,),
        in_specs=[
            pl.BlockSpec((Bt, S_dec, D_MODEL), lambda b: (b, 0, 0)),
            pl.BlockSpec((Bt, S_enc, D_MODEL), lambda b: (b, 0, 0)),
            pl.BlockSpec((Bt, S_dec, S_dec), lambda b: (b, 0, 0)),
            pl.BlockSpec((Bt, S_dec, S_enc), lambda b: (b, 0, 0)),
            pl.BlockSpec((D_MODEL, 3 * D_Q), const2),
            pl.BlockSpec((D_V, D_MODEL), const2),
            pl.BlockSpec((D_MODEL, D_Q), const2),
            pl.BlockSpec((D_MODEL, 2 * D_Q), const2),
            pl.BlockSpec((D_V, D_MODEL), const2),
            pl.BlockSpec((D_MODEL, D_FF), const2),
            pl.BlockSpec((D_FF, D_MODEL), const2),
        ],
        out_specs=pl.BlockSpec((Bt, S_dec, D_MODEL), lambda b: (b, 0, 0)),
    )
    return pl.pallas_call(
        _decoder_layer_kernel,
        out_shape=jax.ShapeDtypeStruct((B, S_dec, D_MODEL), jnp.float32),
        grid_spec=grid_spec,
        compiler_params=pltpu.CompilerParams(
            dimension_semantics=("parallel",)),
    )(dec, enc, sm, cm, wqkv_s, wfc_s_b, wq_c_b, wkv_c, wfc_c_b, w1_b, w2_b)


def decoder_layer_ref(dec, enc, self_mask, cross_mask,
                      wq_s, wk_s, wv_s, wfc_s,
                      wq_c, wk_c, wv_c, wfc_c,
                      w1, w2):
    # Pure-JAX (f32) reference mirroring the PyTorch DecoderLayer forward.
    def ln(t):
        mu = jnp.mean(t, axis=-1, keepdims=True)
        tc = t - mu
        var = jnp.mean(tc * tc, axis=-1, keepdims=True)
        return tc / jnp.sqrt(var + LN_EPS)

    def mha(xq, xkv, mask, wq, wk, wv, wfc):
        q = jnp.einsum("bsd,df->bsf", xq, wq)
        k = jnp.einsum("bsd,df->bsf", xkv, wk)
        v = jnp.einsum("bsd,df->bsf", xkv, wv)
        score = jnp.einsum("bqf,bkf->bqk", q, k) / jnp.sqrt(jnp.float32(D_Q))
        m = mask != 0
        score = jnp.where(m, -1e9, score)
        attn = jax.nn.softmax(score, axis=-1)
        attn = jnp.where(m, 0.0, attn)
        ctx = jnp.einsum("bqk,bkf->bqf", attn, v)
        return ln(jnp.einsum("bqf,fd->bqd", ctx, wfc) + xq)

    d1 = mha(dec, dec, self_mask, wq_s, wk_s, wv_s, wfc_s)
    d2 = mha(d1, enc, cross_mask, wq_c, wk_c, wv_c, wfc_c)
    h = jnp.maximum(jnp.einsum("bsd,df->bsf", d2, w1), 0.0)
    ff = jnp.einsum("bsf,fd->bsd", h, w2)
    return ln(ff + d2)


if __name__ == "__main__":
    B, S_DEC, S_ENC = 2, 8, 16
    key = jax.random.PRNGKey(0)
    ks = jax.random.split(key, 13)

    dec = jax.random.normal(ks[0], (B, S_DEC, D_MODEL), jnp.float32)
    enc = jax.random.normal(ks[1], (B, S_ENC, D_MODEL), jnp.float32)

    # Masks: nonzero => masked (torch masked_fill convention).
    causal = (jnp.arange(S_DEC)[:, None] < jnp.arange(S_DEC)[None, :])
    self_mask = jnp.broadcast_to(causal, (B, S_DEC, S_DEC)).astype(jnp.float32)
    cross_mask = (jax.random.uniform(ks[2], (B, S_DEC, S_ENC)) < 0.25).astype(
        jnp.float32)

    s_in = 1.0 / jnp.sqrt(jnp.float32(D_MODEL))
    s_v = 1.0 / jnp.sqrt(jnp.float32(D_V))
    s_ff = 1.0 / jnp.sqrt(jnp.float32(D_FF))
    wq_s = jax.random.normal(ks[3], (D_MODEL, D_Q), jnp.float32) * s_in
    wk_s = jax.random.normal(ks[4], (D_MODEL, D_Q), jnp.float32) * s_in
    wv_s = jax.random.normal(ks[5], (D_MODEL, D_V), jnp.float32) * s_in
    wfc_s = jax.random.normal(ks[6], (D_V, D_MODEL), jnp.float32) * s_v
    wq_c = jax.random.normal(ks[7], (D_MODEL, D_Q), jnp.float32) * s_in
    wk_c = jax.random.normal(ks[8], (D_MODEL, D_Q), jnp.float32) * s_in
    wv_c = jax.random.normal(ks[9], (D_MODEL, D_V), jnp.float32) * s_in
    wfc_c = jax.random.normal(ks[10], (D_V, D_MODEL), jnp.float32) * s_v
    w1 = jax.random.normal(ks[11], (D_MODEL, D_FF), jnp.float32) * s_in
    w2 = jax.random.normal(ks[12], (D_FF, D_MODEL), jnp.float32) * s_ff

    args = (dec, enc, self_mask, cross_mask,
            wq_s, wk_s, wv_s, wfc_s, wq_c, wk_c, wv_c, wfc_c, w1, w2)

    out = jax.block_until_ready(decoder_layer(*args))
    ref = decoder_layer_ref(*args)

    assert out.shape == (B, S_DEC, D_MODEL)
    err = float(jnp.max(jnp.abs(out - ref)))
    # bf16 MXU operands (f32 accumulation) => loosened tolerance vs f32 ref.
    assert err < 5e-2, f"mismatch vs pure-JAX reference: max abs err = {err}"
    print("KERNEL_OK")
</pallas_src>

<mosaic_0001>
module attributes {stable_mosaic.version = 11 : i64} {
  func.func @_decoder_layer_kernel(%arg0: i32, %arg1: memref<2x8x256xf32, #tpu.memory_space<vmem>>, %arg2: memref<2x16x256xf32, #tpu.memory_space<vmem>>, %arg3: memref<2x8x8xi8, #tpu.memory_space<vmem>>, %arg4: memref<2x8x16xi8, #tpu.memory_space<vmem>>, %arg5: memref<256x192xbf16, #tpu.memory_space<vmem>>, %arg6: memref<64x256xbf16, #tpu.memory_space<vmem>>, %arg7: memref<256x64xbf16, #tpu.memory_space<vmem>>, %arg8: memref<256x128xbf16, #tpu.memory_space<vmem>>, %arg9: memref<64x256xbf16, #tpu.memory_space<vmem>>, %arg10: memref<256x256xbf16, #tpu.memory_space<vmem>>, %arg11: memref<256x256xbf16, #tpu.memory_space<vmem>>, %arg12: memref<2x8x256xf32, #tpu.memory_space<vmem>>) attributes {dimension_semantics = [#tpu.dimension_semantics<parallel>], iteration_bounds = array<i64: 1>, scalar_prefetch = 0 : i64, scratch_operands = 0 : i64, tpu.core_type = #tpu.core_type<tc>, window_params = [{transform_indices = @transform_0, window_bounds = array<i64: 2, 8, 256>}, {transform_indices = @transform_1, window_bounds = array<i64: 2, 16, 256>}, {transform_indices = @transform_2, window_bounds = array<i64: 2, 8, 8>}, {transform_indices = @transform_3, window_bounds = array<i64: 2, 8, 16>}, {pipeline_mode = #tpu.pipeline_mode<synchronous>, transform_indices = @transform_4, window_bounds = array<i64: 256, 192>}, {pipeline_mode = #tpu.pipeline_mode<synchronous>, transform_indices = @transform_5, window_bounds = array<i64: 64, 256>}, {pipeline_mode = #tpu.pipeline_mode<synchronous>, transform_indices = @transform_6, window_bounds = array<i64: 256, 64>}, {pipeline_mode = #tpu.pipeline_mode<synchronous>, transform_indices = @transform_7, window_bounds = array<i64: 256, 128>}, {pipeline_mode = #tpu.pipeline_mode<synchronous>, transform_indices = @transform_8, window_bounds = array<i64: 64, 256>}, {pipeline_mode = #tpu.pipeline_mode<synchronous>, transform_indices = @transform_9, window_bounds = array<i64: 256, 256>}, {pipeline_mode = #tpu.pipeline_mode<synchronous>, transform_indices = @transform_10, window_bounds = array<i64: 256, 256>}, {transform_indices = @transform_11, window_bounds = array<i64: 2, 8, 256>}]} {
    %c0 = arith.constant 0 : index
    %c0_0 = arith.constant 0 : index
    %c0_1 = arith.constant 0 : index
    %0 = vector.load %arg1[%c0, %c0_0, %c0_1] : memref<2x8x256xf32, #tpu.memory_space<vmem>>, vector<2x8x256xf32>
    %1 = vector.shape_cast %0 : vector<2x8x256xf32> to vector<16x256xf32>
    %2 = arith.truncf %1 : vector<16x256xf32> to vector<16x256xbf16>
    %c0_2 = arith.constant 0 : index
    %c0_3 = arith.constant 0 : index
    %3 = vector.load %arg5[%c0_2, %c0_3] : memref<256x192xbf16, #tpu.memory_space<vmem>>, vector<256x192xbf16>
    %cst = arith.constant dense<0.000000e+00> : vector<16x192xf32>
    %4 = tpu.matmul %2, %3, %cst {dimension_numbers = #tpu.dot_dimension_numbers<[1], [0], [0], [1], [0, 0, 1, 1], [], []>} : vector<16x256xbf16>, vector<256x192xbf16>, vector<16x192xf32> -> vector<16x192xf32>
    %5 = vector.extract_strided_slice %4 {offsets = [0, 0], sizes = [16, 64], strides = [1, 1]} : vector<16x192xf32> to vector<16x64xf32>
    %6 = vector.shape_cast %5 : vector<16x64xf32> to vector<2x8x64xf32>
    %7 = vector.extract_strided_slice %4 {offsets = [0, 64], sizes = [16, 64], strides = [1, 1]} : vector<16x192xf32> to vector<16x64xf32>
    %8 = vector.shape_cast %7 : vector<16x64xf32> to vector<2x8x64xf32>
    %9 = vector.extract_strided_slice %4 {offsets = [0, 128], sizes = [16, 64], strides = [1, 1]} : vector<16x192xf32> to vector<16x64xf32>
    %10 = vector.shape_cast %9 : vector<16x64xf32> to vector<2x8x64xf32>
    %c0_4 = arith.constant 0 : index
    %c0_5 = arith.constant 0 : index
    %c0_6 = arith.constant 0 : index
    %11 = vector.load %arg3[%c0_4, %c0_5, %c0_6] : memref<2x8x8xi8, #tpu.memory_space<vmem>>, vector<2x8x8xi8>
    %c0_i8 = arith.constant 0 : i8
    %12 = vector.broadcast %c0_i8 : i8 to vector<2x8x8xi8>
    %13 = arith.cmpi ne, %11, %12 : vector<2x8x8xi8>
    "tpu.trace_start"() <{level = 10 : i32, message = "bqd,bkd->bqk"}> : () -> ()
    %cst_7 = arith.constant dense<0.000000e+00> : vector<2x8x8xf32>
    %14 = tpu.matmul %6, %8, %cst_7 {dimension_numbers = #tpu.dot_dimension_numbers<[2], [2], [1], [1], [0, 0, 0, 1, 1, 1], [0], [0]>} : vector<2x8x64xf32>, vector<2x8x64xf32>, vector<2x8x8xf32> -> vector<2x8x8xf32>
    "tpu.trace_stop"() : () -> ()
    %cst_8 = arith.constant 1.250000e-01 : f32
    %15 = vector.broadcast %cst_8 : f32 to vector<2x8x8xf32>
    %16 = arith.mulf %14, %15 : vector<2x8x8xf32>
    %cst_9 = arith.constant -1.000000e+09 : f32
    %17 = vector.broadcast %cst_9 : f32 to vector<2x8x8xf32>
    %18 = arith.select %13, %17, %16 : vector<2x8x8xi1>, vector<2x8x8xf32>
    %cst_10 = arith.constant dense<0xFF800000> : vector<2x8xf32>
    %19 = vector.multi_reduction <maximumf>, %18, %cst_10 [2] : vector<2x8x8xf32> to vector<2x8xf32>
    %20 = vector.shape_cast %19 : vector<2x8xf32> to vector<2x8x1xf32>
    %21 = vector.broadcast %20 : vector<2x8x1xf32> to vector<2x8x8xf32>
    %22 = arith.subf %18, %21 : vector<2x8x8xf32>
    %23 = math.exp %22 : vector<2x8x8xf32>
    %cst_11 = arith.constant dense<0.000000e+00> : vector<2x8xf32>
    %24 = vector.multi_reduction <add>, %23, %cst_11 [2] : vector<2x8x8xf32> to vector<2x8xf32>
    %25 = vector.shape_cast %24 : vector<2x8xf32> to vector<2x8x1xf32>
    %26 = tpu.reciprocal %25 {approx = true} : vector<2x8x1xf32> -> vector<2x8x1xf32>
    %27 = vector.broadcast %26 : vector<2x8x1xf32> to vector<2x8x8xf32>
    %28 = arith.mulf %23, %27 : vector<2x8x8xf32>
    %cst_12 = arith.constant 0.000000e+00 : f32
    %29 = vector.broadcast %cst_12 : f32 to vector<2x8x8xf32>
    %30 = arith.select %13, %29, %28 : vector<2x8x8xi1>, vector<2x8x8xf32>
    "tpu.trace_start"() <{level = 10 : i32, message = "bqk,bkd->bqd"}> : () -> ()
    %cst_13 = arith.constant dense<0.000000e+00> : vector<2x8x64xf32>
    %31 = tpu.matmul %30, %10, %cst_13 {dimension_numbers = #tpu.dot_dimension_numbers<[2], [1], [1], [2], [0, 0, 0, 1, 1, 2], [0], [0]>} : vector<2x8x8xf32>, vector<2x8x64xf32>, vector<2x8x64xf32> -> vector<2x8x64xf32>
    "tpu.trace_stop"() : () -> ()
    %32 = vector.shape_cast %31 : vector<2x8x64xf32> to vector<16x64xf32>
    %33 = arith.truncf %32 : vector<16x64xf32> to vector<16x64xbf16>
    %c0_14 = arith.constant 0 : index
    %c0_15 = arith.constant 0 : index
    %34 = vector.load %arg6[%c0_14, %c0_15] : memref<64x256xbf16, #tpu.memory_space<vmem>>, vector<64x256xbf16>
    %cst_16 = arith.constant dense<0.000000e+00> : vector<16x256xf32>
    %35 = tpu.matmul %33, %34, %cst_16 {dimension_numbers = #tpu.dot_dimension_numbers<[1], [0], [0], [1], [0, 0, 1, 1], [], []>} : vector<16x64xbf16>, vector<64x256xbf16>, vector<16x256xf32> -> vector<16x256xf32>
    %36 = arith.addf %35, %1 : vector<16x256xf32>
    %cst_17 = arith.constant dense<0.000000e+00> : vector<16xf32>
    %37 = vector.multi_reduction <add>, %36, %cst_17 [1] : vector<16x256xf32> to vector<16xf32>
    %38 = vector.shape_cast %37 : vector<16xf32> to vector<16x1xf32>
    %cst_18 = arith.constant 2.560000e+02 : f32
    %39 = vector.broadcast %cst_18 : f32 to vector<16x1xf32>
    %40 = arith.divf %38, %39 : vector<16x1xf32>
    %41 = vector.broadcast %40 : vector<16x1xf32> to vector<16x256xf32>
    %42 = arith.subf %36, %41 : vector<16x256xf32>
    %43 = arith.mulf %42, %42 : vector<16x256xf32>
    %cst_19 = arith.constant dense<0.000000e+00> : vector<16xf32>
    %44 = vector.multi_reduction <add>, %43, %cst_19 [1] : vector<16x256xf32> to vector<16xf32>
    %45 = vector.shape_cast %44 : vector<16xf32> to vector<16x1xf32>
    %cst_20 = arith.constant 2.560000e+02 : f32
    %46 = vector.broadcast %cst_20 : f32 to vector<16x1xf32>
    %47 = arith.divf %45, %46 : vector<16x1xf32>
    %cst_21 = arith.constant 9.99999974E-6 : f32
    %48 = vector.broadcast %cst_21 : f32 to vector<16x1xf32>
    %49 = arith.addf %47, %48 : vector<16x1xf32>
    %50 = math.rsqrt %49 : vector<16x1xf32>
    %51 = vector.broadcast %50 : vector<16x1xf32> to vector<16x256xf32>
    %52 = arith.mulf %42, %51 : vector<16x256xf32>
    %c0_22 = arith.constant 0 : index
    %c0_23 = arith.constant 0 : index
    %c0_24 = arith.constant 0 : index
    %53 = vector.load %arg2[%c0_22, %c0_23, %c0_24] : memref<2x16x256xf32, #tpu.memory_space<vmem>>, vector<2x16x256xf32>
    %54 = vector.shape_cast %53 : vector<2x16x256xf32> to vector<32x256xf32>
    %55 = arith.truncf %52 : vector<16x256xf32> to vector<16x256xbf16>
    %c0_25 = arith.constant 0 : index
    %c0_26 = arith.constant 0 : index
    %56 = vector.load %arg7[%c0_25, %c0_26] : memref<256x64xbf16, #tpu.memory_space<vmem>>, vector<256x64xbf16>
    %cst_27 = arith.constant dense<0.000000e+00> : vector<16x64xf32>
    %57 = tpu.matmul %55, %56, %cst_27 {dimension_numbers = #tpu.dot_dimension_numbers<[1], [0], [0], [1], [0, 0, 1, 1], [], []>} : vector<16x256xbf16>, vector<256x64xbf16>, vector<16x64xf32> -> vector<16x64xf32>
    %58 = vector.shape_cast %57 : vector<16x64xf32> to vector<2x8x64xf32>
    %59 = arith.truncf %54 : vector<32x256xf32> to vector<32x256xbf16>
    %c0_28 = arith.constant 0 : index
    %c0_29 = arith.constant 0 : index
    %60 = vector.load %arg8[%c0_28, %c0_29] : memref<256x128xbf16, #tpu.memory_space<vmem>>, vector<256x128xbf16>
    %cst_30 = arith.constant dense<0.000000e+00> : vector<32x128xf32>
    %61 = tpu.matmul %59, %60, %cst_30 {dimension_numbers = #tpu.dot_dimension_numbers<[1], [0], [0], [1], [0, 0, 1, 1], [], []>} : vector<32x256xbf16>, vector<256x128xbf16>, vector<32x128xf32> -> vector<32x128xf32>
    %62 = vector.extract_strided_slice %61 {offsets = [0, 0], sizes = [32, 64], strides = [1, 1]} : vector<32x128xf32> to vector<32x64xf32>
    %63 = vector.shape_cast %62 : vector<32x64xf32> to vector<2x16x64xf32>
    %64 = vector.extract_strided_slice %61 {offsets = [0, 64], sizes = [32, 64], strides = [1, 1]} : vector<32x128xf32> to vector<32x64xf32>
    %65 = vector.shape_cast %64 : vector<32x64xf32> to vector<2x16x64xf32>
    %c0_31 = arith.constant 0 : index
    %c0_32 = arith.constant 0 : index
    %c0_33 = arith.constant 0 : index
    %66 = vector.load %arg4[%c0_31, %c0_32, %c0_33] : memref<2x8x16xi8, #tpu.memory_space<vmem>>, vector<2x8x16xi8>
    %c0_i8_34 = arith.constant 0 : i8
    %67 = vector.broadcast %c0_i8_34 : i8 to vector<2x8x16xi8>
    %68 = arith.cmpi ne, %66, %67 : vector<2x8x16xi8>
    "tpu.trace_start"() <{level = 10 : i32, message = "bqd,bkd->bqk"}> : () -> ()
    %cst_35 = arith.constant dense<0.000000e+00> : vector<2x8x16xf32>
    %69 = tpu.matmul %58, %63, %cst_35 {dimension_numbers = #tpu.dot_dimension_numbers<[2], [2], [1], [1], [0, 0, 0, 1, 1, 1], [0], [0]>} : vector<2x8x64xf32>, vector<2x16x64xf32>, vector<2x8x16xf32> -> vector<2x8x16xf32>
    "tpu.trace_stop"() : () -> ()
    %cst_36 = arith.constant 1.250000e-01 : f32
    %70 = vector.broadcast %cst_36 : f32 to vector<2x8x16xf32>
    %71 = arith.mulf %69, %70 : vector<2x8x16xf32>
    %cst_37 = arith.constant -1.000000e+09 : f32
    %72 = vector.broadcast %cst_37 : f32 to vector<2x8x16xf32>
    %73 = arith.select %68, %72, %71 : vector<2x8x16xi1>, vector<2x8x16xf32>
    %cst_38 = arith.constant dense<0xFF800000> : vector<2x8xf32>
    %74 = vector.multi_reduction <maximumf>, %73, %cst_38 [2] : vector<2x8x16xf32> to vector<2x8xf32>
    %75 = vector.shape_cast %74 : vector<2x8xf32> to vector<2x8x1xf32>
    %76 = vector.broadcast %75 : vector<2x8x1xf32> to vector<2x8x16xf32>
    %77 = arith.subf %73, %76 : vector<2x8x16xf32>
    %78 = math.exp %77 : vector<2x8x16xf32>
    %cst_39 = arith.constant dense<0.000000e+00> : vector<2x8xf32>
    %79 = vector.multi_reduction <add>, %78, %cst_39 [2] : vector<2x8x16xf32> to vector<2x8xf32>
    %80 = vector.shape_cast %79 : vector<2x8xf32> to vector<2x8x1xf32>
    %81 = tpu.reciprocal %80 {approx = true} : vector<2x8x1xf32> -> vector<2x8x1xf32>
    %82 = vector.broadcast %81 : vector<2x8x1xf32> to vector<2x8x16xf32>
    %83 = arith.mulf %78, %82 : vector<2x8x16xf32>
    %cst_40 = arith.constant 0.000000e+00 : f32
    %84 = vector.broadcast %cst_40 : f32 to vector<2x8x16xf32>
    %85 = arith.select %68, %84, %83 : vector<2x8x16xi1>, vector<2x8x16xf32>
    "tpu.trace_start"() <{level = 10 : i32, message = "bqk,bkd->bqd"}> : () -> ()
    %cst_41 = arith.constant dense<0.000000e+00> : vector<2x8x64xf32>
    %86 = tpu.matmul %85, %65, %cst_41 {dimension_numbers = #tpu.dot_dimension_numbers<[2], [1], [1], [2], [0, 0, 0, 1, 1, 2], [0], [0]>} : vector<2x8x16xf32>, vector<2x16x64xf32>, vector<2x8x64xf32> -> vector<2x8x64xf32>
    "tpu.trace_stop"() : () -> ()
    %87 = vector.shape_cast %86 : vector<2x8x64xf32> to vector<16x64xf32>
    %88 = arith.truncf %87 : vector<16x64xf32> to vector<16x64xbf16>
    %c0_42 = arith.constant 0 : index
    %c0_43 = arith.constant 0 : index
    %89 = vector.load %arg9[%c0_42, %c0_43] : memref<64x256xbf16, #tpu.memory_space<vmem>>, vector<64x256xbf16>
    %cst_44 = arith.constant dense<0.000000e+00> : vector<16x256xf32>
    %90 = tpu.matmul %88, %89, %cst_44 {dimension_numbers = #tpu.dot_dimension_numbers<[1], [0], [0], [1], [0, 0, 1, 1], [], []>} : vector<16x64xbf16>, vector<64x256xbf16>, vector<16x256xf32> -> vector<16x256xf32>
    %91 = arith.addf %90, %52 : vector<16x256xf32>
    %cst_45 = arith.constant dense<0.000000e+00> : vector<16xf32>
    %92 = vector.multi_reduction <add>, %91, %cst_45 [1] : vector<16x256xf32> to vector<16xf32>
    %93 = vector.shape_cast %92 : vector<16xf32> to vector<16x1xf32>
    %cst_46 = arith.constant 2.560000e+02 : f32
    %94 = vector.broadcast %cst_46 : f32 to vector<16x1xf32>
    %95 = arith.divf %93, %94 : vector<16x1xf32>
    %96 = vector.broadcast %95 : vector<16x1xf32> to vector<16x256xf32>
    %97 = arith.subf %91, %96 : vector<16x256xf32>
    %98 = arith.mulf %97, %97 : vector<16x256xf32>
    %cst_47 = arith.constant dense<0.000000e+00> : vector<16xf32>
    %99 = vector.multi_reduction <add>, %98, %cst_47 [1] : vector<16x256xf32> to vector<16xf32>
    %100 = vector.shape_cast %99 : vector<16xf32> to vector<16x1xf32>
    %cst_48 = arith.constant 2.560000e+02 : f32
    %101 = vector.broadcast %cst_48 : f32 to vector<16x1xf32>
    %102 = arith.divf %100, %101 : vector<16x1xf32>
    %cst_49 = arith.constant 9.99999974E-6 : f32
    %103 = vector.broadcast %cst_49 : f32 to vector<16x1xf32>
    %104 = arith.addf %102, %103 : vector<16x1xf32>
    %105 = math.rsqrt %104 : vector<16x1xf32>
    %106 = vector.broadcast %105 : vector<16x1xf32> to vector<16x256xf32>
    %107 = arith.mulf %97, %106 : vector<16x256xf32>
    %108 = arith.truncf %107 : vector<16x256xf32> to vector<16x256xbf16>
    %c0_50 = arith.constant 0 : index
    %c0_51 = arith.constant 0 : index
    %109 = vector.load %arg10[%c0_50, %c0_51] : memref<256x256xbf16, #tpu.memory_space<vmem>>, vector<256x256xbf16>
    %cst_52 = arith.constant dense<0.000000e+00> : vector<16x256xf32>
    %110 = tpu.matmul %108, %109, %cst_52 {dimension_numbers = #tpu.dot_dimension_numbers<[1], [0], [0], [1], [0, 0, 1, 1], [], []>} : vector<16x256xbf16>, vector<256x256xbf16>, vector<16x256xf32> -> vector<16x256xf32>
    %cst_53 = arith.constant 0.000000e+00 : f32
    %111 = vector.broadcast %cst_53 : f32 to vector<16x256xf32>
    %112 = arith.maximumf %110, %111 : vector<16x256xf32>
    %113 = arith.truncf %112 : vector<16x256xf32> to vector<16x256xbf16>
    %c0_54 = arith.constant 0 : index
    %c0_55 = arith.constant 0 : index
    %114 = vector.load %arg11[%c0_54, %c0_55] : memref<256x256xbf16, #tpu.memory_space<vmem>>, vector<256x256xbf16>
    %cst_56 = arith.constant dense<0.000000e+00> : vector<16x256xf32>
    %115 = tpu.matmul %113, %114, %cst_56 {dimension_numbers = #tpu.dot_dimension_numbers<[1], [0], [0], [1], [0, 0, 1, 1], [], []>} : vector<16x256xbf16>, vector<256x256xbf16>, vector<16x256xf32> -> vector<16x256xf32>
    %116 = arith.addf %115, %107 : vector<16x256xf32>
    %cst_57 = arith.constant dense<0.000000e+00> : vector<16xf32>
    %117 = vector.multi_reduction <add>, %116, %cst_57 [1] : vector<16x256xf32> to vector<16xf32>
    %118 = vector.shape_cast %117 : vector<16xf32> to vector<16x1xf32>
    %cst_58 = arith.constant 2.560000e+02 : f32
    %119 = vector.broadcast %cst_58 : f32 to vector<16x1xf32>
    %120 = arith.divf %118, %119 : vector<16x1xf32>
    %121 = vector.broadcast %120 : vector<16x1xf32> to vector<16x256xf32>
    %122 = arith.subf %116, %121 : vector<16x256xf32>
    %123 = arith.mulf %122, %122 : vector<16x256xf32>
    %cst_59 = arith.constant dense<0.000000e+00> : vector<16xf32>
    %124 = vector.multi_reduction <add>, %123, %cst_59 [1] : vector<16x256xf32> to vector<16xf32>
    %125 = vector.shape_cast %124 : vector<16xf32> to vector<16x1xf32>
    %cst_60 = arith.constant 2.560000e+02 : f32
    %126 = vector.broadcast %cst_60 : f32 to vector<16x1xf32>
    %127 = arith.divf %125, %126 : vector<16x1xf32>
    %cst_61 = arith.constant 9.99999974E-6 : f32
    %128 = vector.broadcast %cst_61 : f32 to vector<16x1xf32>
    %129 = arith.addf %127, %128 : vector<16x1xf32>
    %130 = math.rsqrt %129 : vector<16x1xf32>
    %131 = vector.broadcast %130 : vector<16x1xf32> to vector<16x256xf32>
    %132 = arith.mulf %122, %131 : vector<16x256xf32>
    %133 = vector.shape_cast %132 : vector<16x256xf32> to vector<2x8x256xf32>
    %c0_62 = arith.constant 0 : index
    %c0_63 = arith.constant 0 : index
    %c0_64 = arith.constant 0 : index
    %134 = vector.load %arg12[%c0_62, %c0_63, %c0_64] : memref<2x8x256xf32, #tpu.memory_space<vmem>>, vector<2x8x256xf32>
    tpu.vector_store %arg12[%c0_62, %c0_63, %c0_64], %133 {strides = array<i32>} : memref<2x8x256xf32, #tpu.memory_space<vmem>>, vector<2x8x256xf32>,
    return
  }
  func.func @transform_0(%arg0: i32) -> (i32, i32, i32) {
    %c0_i32 = arith.constant 0 : i32
    %c0_i32_0 = arith.constant 0 : i32
    %c0_i32_1 = arith.constant 0 : i32
    return %arg0, %c0_i32, %c0_i32_0 : i32, i32, i32
  }
  func.func @transform_1(%arg0: i32) -> (i32, i32, i32) {
    %c0_i32 = arith.constant 0 : i32
    %c0_i32_0 = arith.constant 0 : i32
    %c0_i32_1 = arith.constant 0 : i32
    return %arg0, %c0_i32, %c0_i32_0 : i32, i32, i32
  }
  func.func @transform_2(%arg0: i32) -> (i32, i32, i32) {
    %c0_i32 = arith.constant 0 : i32
    %c0_i32_0 = arith.constant 0 : i32
    %c0_i32_1 = arith.constant 0 : i32
    return %arg0, %c0_i32, %c0_i32_0 : i32, i32, i32
  }
  func.func @transform_3(%arg0: i32) -> (i32, i32, i32) {
    %c0_i32 = arith.constant 0 : i32
    %c0_i32_0 = arith.constant 0 : i32
    %c0_i32_1 = arith.constant 0 : i32
    return %arg0, %c0_i32, %c0_i32_0 : i32, i32, i32
  }
  func.func @transform_4(%arg0: i32) -> (i32, i32) {
    %c0_i32 = arith.constant 0 : i32
    %c0_i32_0 = arith.constant 0 : i32
    %c0_i32_1 = arith.constant 0 : i32
    return %c0_i32, %c0_i32_0 : i32, i32
  }
  func.func @transform_5(%arg0: i32) -> (i32, i32) {
    %c0_i32 = arith.constant 0 : i32
    %c0_i32_0 = arith.constant 0 : i32
    %c0_i32_1 = arith.constant 0 : i32
    return %c0_i32, %c0_i32_0 : i32, i32
  }
  func.func @transform_6(%arg0: i32) -> (i32, i32) {
    %c0_i32 = arith.constant 0 : i32
    %c0_i32_0 = arith.constant 0 : i32
    %c0_i32_1 = arith.constant 0 : i32
    return %c0_i32, %c0_i32_0 : i32, i32
  }
  func.func @transform_7(%arg0: i32) -> (i32, i32) {
    %c0_i32 = arith.constant 0 : i32
    %c0_i32_0 = arith.constant 0 : i32
    %c0_i32_1 = arith.constant 0 : i32
    return %c0_i32, %c0_i32_0 : i32, i32
  }
  func.func @transform_8(%arg0: i32) -> (i32, i32) {
    %c0_i32 = arith.constant 0 : i32
    %c0_i32_0 = arith.constant 0 : i32
    %c0_i32_1 = arith.constant 0 : i32
    return %c0_i32, %c0_i32_0 : i32, i32
  }
  func.func @transform_9(%arg0: i32) -> (i32, i32) {
    %c0_i32 = arith.constant 0 : i32
    %c0_i32_0 = arith.constant 0 : i32
    %c0_i32_1 = arith.constant 0 : i32
    return %c0_i32, %c0_i32_0 : i32, i32
  }
  func.func @transform_10(%arg0: i32) -> (i32, i32) {
    %c0_i32 = arith.constant 0 : i32
    %c0_i32_0 = arith.constant 0 : i32
    %c0_i32_1 = arith.constant 0 : i32
    return %c0_i32, %c0_i32_0 : i32, i32
  }
  func.func @transform_11(%arg0: i32) -> (i32, i32, i32) {
    %c0_i32 = arith.constant 0 : i32
    %c0_i32_0 = arith.constant 0 : i32
    %c0_i32_1 = arith.constant 0 : i32
    return %arg0, %c0_i32, %c0_i32_0 : i32, i32, i32
  }
}

</mosaic_0001>

<bundles_post_ra>
// kernel: decoder_layer.1
= control target key start
LH: loop header
LB: loop body
LE: loop exit
PB: predicated region body
PF: predicated region fallthrough
CT: control target
= control target key end

     0   :  { %s3424_s0 = inlined_call_operand.vmem [shape: f32[2,8,256], index: 0, kind: input, shape index: {}]   ;;  %s3425_s1 = inlined_call_operand.vmem [shape: f32[2,16,256], index: 1, kind: input, shape index: {}]   ;;  %s3426_s2 = inlined_call_operand.vmem [shape: s8[2,8,8], index: 2, kind: input, shape index: {}]   ;;  %s3427_s3 = inlined_call_operand.vmem [shape: s8[2,8,16], index: 3, kind: input, shape index: {}]   ;;  %s3428_s4 = inlined_call_operand.vmem [shape: bf16[256,192], index: 4, kind: input, shape index: {}]   ;;  %s3429_s5 = inlined_call_operand.vmem [shape: bf16[64,256], index: 5, kind: input, shape index: {}]   ;;  %s3430_s6 = inlined_call_operand.vmem [shape: bf16[256,64], index: 6, kind: input, shape index: {}]   ;;  %s3431_s7 = inlined_call_operand.vmem [shape: bf16[256,128], index: 7, kind: input, shape index: {}]   ;;  %s3432_s8 = inlined_call_operand.vmem [shape: bf16[64,256], index: 8, kind: input, shape index: {}]   ;;  %s3433_s9 = inlined_call_operand.vmem [shape: bf16[256,256], index: 9, kind: input, shape index: {}]   ;;  %s3434_s10 = inlined_call_operand.vmem [shape: bf16[256,256], index: 10, kind: input, shape index: {}]   ;;  %s3435_s11 = inlined_call_operand.hbm [shape: f32[2,8,256], index: 11, kind: output, shape index: {}]  }
   0x1   :  { %v2433_v0 = vld [vmem:[%s3428_s4 + $0x4] ss:$8 sps:$4 sm:$0xff]   ;;  %v2435_v1 = vld [vmem:[%s3428_s4] ss:$8 sps:$4 sm:$0xff]   ;;  %v2436_v2 = vld [vmem:[%s3428_s4 + $0x14] ss:$8 sps:$4 sm:$0xff]  }
   0x2   :  { %240 = vmatprep.subr.bf16.mxu0 %v2433_v0  ;;  %v2438_v3 = vld [vmem:[%s3428_s4 + $0x10] ss:$8 sps:$4 sm:$0xff]   ;;  %v2439_v4 = vld [vmem:[%s3428_s4 + $0x24] ss:$8 sps:$4 sm:$0xff]   ;;  %v2441_v5 = vld [vmem:[%s3428_s4 + $0x20] ss:$8 sps:$4 sm:$0xff]  }
   0x3   :  { %241 = vmatpush1.bf16.msra.mxu0 %v2435_v1  ;;  %v2442_v6 = vld [vmem:[%s3428_s4 + $0x34] ss:$8 sps:$4 sm:$0xff]   ;;  %v2444_v7 = vld [vmem:[%s3428_s4 + $0x30] ss:$8 sps:$4 sm:$0xff]   ;;  %v2445_v8 = vld [vmem:[%s3428_s4 + $0x44] ss:$8 sps:$4 sm:$0xff]  }
   0x4   :  { %242 = vmatprep.subr.bf16.mxu0 %v2436_v2  ;;  %v2447_v9 = vld [vmem:[%s3428_s4 + $0x40] ss:$8 sps:$4 sm:$0xff]   ;;  %v2448_v10 = vld [vmem:[%s3428_s4 + $0x54] ss:$8 sps:$4 sm:$0xff]   ;;  %v2450_v11 = vld [vmem:[%s3428_s4 + $0x50] ss:$8 sps:$4 sm:$0xff]  }
   0x5   :  { %v2451_v12 = vld [vmem:[%s3428_s4 + $0x64] ss:$8 sps:$4 sm:$0xff]   ;;  %v2800_v14 = vld [vmem:[%s3424_s0 + $0x18] sm:$0xff]  ;;  %v2453_v15 = vld [vmem:[%s3428_s4 + $0x60] ss:$8 sps:$4 sm:$0xff]  }
   0x6   :  { %v2795_v13 = vld [vmem:[%s3424_s0 + $0x8] sm:$0xff]  ;;  %v2454_v16 = vld [vmem:[%s3428_s4 + $0x74] ss:$8 sps:$4 sm:$0xff]   ;;  %v2456_v18 = vld [vmem:[%s3428_s4 + $0x70] ss:$8 sps:$4 sm:$0xff]  }
   0x7   :  { %243 = vmatpush1.bf16.msra.mxu0 %v2438_v3  ;;  %v47_v17 = vpack.c.bf16 %v2800_v14, %v2795_v13  ;;  %v2457_v19 = vld [vmem:[%s3428_s4 + $0x84] ss:$8 sps:$4 sm:$0xff]   ;;  %v2459_v20 = vld [vmem:[%s3428_s4 + $0x80] ss:$8 sps:$4 sm:$0xff]   ;;  %v2460_v21 = vld [vmem:[%s3428_s4 + $0x94] ss:$8 sps:$4 sm:$0xff]  }
   0x8   :  { %244 = vmatprep.subr.bf16.mxu0 %v2439_v4  ;;  %v2462_v22 = vld [vmem:[%s3428_s4 + $0x90] ss:$8 sps:$4 sm:$0xff]   ;;  %v2463_v23 = vld [vmem:[%s3428_s4 + $0xa4] ss:$8 sps:$4 sm:$0xff]   ;;  %v2465_v24 = vld [vmem:[%s3428_s4 + $0xa0] ss:$8 sps:$4 sm:$0xff]  }
   0x9   :  { %272 = vmatprep.mubr.bf16.mxu0 %v47_v17  ;;  %v2466_v25 = vld [vmem:[%s3428_s4 + $0xb4] ss:$8 sps:$4 sm:$0xff]   ;;  %v2468_v26 = vld [vmem:[%s3428_s4 + $0xb0] ss:$8 sps:$4 sm:$0xff]   ;;  %v2469_v27 = vld [vmem:[%s3428_s4 + $0xc4] ss:$8 sps:$4 sm:$0xff]  }
   0xa   :  { %v2471_v28 = vld [vmem:[%s3428_s4 + $0xc0] ss:$8 sps:$4 sm:$0xff]   ;;  %v2472_v29 = vld [vmem:[%s3428_s4 + $0xd4] ss:$8 sps:$4 sm:$0xff]   ;;  %v2474_v30 = vld [vmem:[%s3428_s4 + $0xd0] ss:$8 sps:$4 sm:$0xff]  }
   0xb   :  { %245 = vmatpush1.bf16.msra.mxu0 %v2441_v5  ;;  %v2475_v31 = vld [vmem:[%s3428_s4 + $0xe4] ss:$8 sps:$4 sm:$0xff]   ;;  %v2477_v32 = vld [vmem:[%s3428_s4 + $0xe0] ss:$8 sps:$4 sm:$0xff]   ;;  %v2478_v33 = vld [vmem:[%s3428_s4 + $0xf4] ss:$8 sps:$4 sm:$0xff]  }
   0xc   :  { %246 = vmatprep.subr.bf16.mxu0 %v2442_v6  ;;  %v2480_v34 = vld [vmem:[%s3428_s4 + $0xf0] ss:$8 sps:$4 sm:$0xff]   ;;  %v2864_v35 = vld [vmem:[%s3424_s0] sm:$0xff] }
   0xd   :  { %v2869_v36 = vld [vmem:[%s3424_s0 + $0x10] sm:$0xff] }
   0xe   :  { %v46_v37 = vpack.c.bf16 %v2869_v36, %v2864_v35 }
   0xf   :  { %247 = vmatpush1.bf16.msra.mxu0 %v2444_v7 }
  0x10   :  { %248 = vmatprep.subr.bf16.mxu0 %v2445_v8 }
  0x13   :  { %249 = vmatpush1.bf16.msra.mxu0 %v2447_v9 }
  0x14   :  { %250 = vmatprep.subr.bf16.mxu0 %v2448_v10 }
  0x17   :  { %251 = vmatpush1.bf16.msra.mxu0 %v2450_v11 }
  0x18   :  { %252 = vmatprep.subr.bf16.mxu0 %v2451_v12 }
  0x1b   :  { %253 = vmatpush1.bf16.msra.mxu0 %v2453_v15 }
  0x1c   :  { %254 = vmatprep.subr.bf16.mxu0 %v2454_v16 }
  0x1f   :  { %255 = vmatpush1.bf16.msra.mxu0 %v2456_v18 }
  0x20   :  { %256 = vmatprep.subr.bf16.mxu0 %v2457_v19 }
  0x23   :  { %257 = vmatpush1.bf16.msra.mxu0 %v2459_v20 }
  0x24   :  { %258 = vmatprep.subr.bf16.mxu0 %v2460_v21 }
  0x27   :  { %259 = vmatpush1.bf16.msra.mxu0 %v2462_v22 }
  0x28   :  { %260 = vmatprep.subr.bf16.mxu0 %v2463_v23 }
  0x2b   :  { %261 = vmatpush1.bf16.msra.mxu0 %v2465_v24 }
  0x2c   :  { %262 = vmatprep.subr.bf16.mxu0 %v2466_v25 }
  0x2f   :  { %263 = vmatpush1.bf16.msra.mxu0 %v2468_v26 }
  0x30   :  { %264 = vmatprep.subr.bf16.mxu0 %v2469_v27 }
  0x33   :  { %265 = vmatpush1.bf16.msra.mxu0 %v2471_v28 }
  0x34   :  { %266 = vmatprep.subr.bf16.mxu0 %v2472_v29 }
  0x37   :  { %267 = vmatpush1.bf16.msra.mxu0 %v2474_v30 }
  0x38   :  { %268 = vmatprep.subr.bf16.mxu0 %v2475_v31 }
  0x3b   :  { %269 = vmatpush1.bf16.msra.mxu0 %v2477_v32 }
  0x3c   :  { %270 = vmatprep.subr.bf16.mxu0 %v2478_v33 }
  0x3f   :  { %271 = vmatpush1.bf16.msra.mxu0 %v2480_v34 }
  0x42   :  { %273 = vmatmul.mubr.bf16.vlgmr.msra.gmra.mrb[0].mxu0 %v46_v37 }
  0x43   :  { %16 = vsyncpa [#allocation3], 0  ;;  %v2685_v38 = vmov 0.0   ;;  %vm2686_vm0 = vmmov 0   ;;  %s2687_s4 = smov 64   ;;  %vm290_vm1 = vcmask 523264  }
  0x44   :  { %2353 = vmatprep.subr.mxu1 %v2685_v38  ;;  %2355 = vmatprep.mubr.msk.f32.mxu1 %vm2686_vm0, %v2685_v38  ;;  %v283_v45 = vld [vmem:[%s3426_s2] sm:$0x3]  ;;  %v284_v46 = vld [vmem:[%s3426_s2 + $0x2] sm:$0x3]  ;;  %v2688_v47 = vmov 0   ;;  %vm452_vm5 = vcmask 64512   ;;  %vm3115_vm7 = vmpackc.low %vm290_vm1, %vm290_vm1 }
  0x45   :  { %vm285_vm2 = vnez %v283_v45  ;;  %vm286_vm3 = vnez %v284_v46  ;;  %v2483_v16 = vld [vmem:[%s3429_s5 + $0x4] ss:$8 sps:$4 sm:$0xff]   ;;  %v2481_v20 = vld [vmem:[%s3429_s5] ss:$8 sps:$4 sm:$0xff]   ;;  %v2486_v21 = vld [vmem:[%s3429_s5 + $0x14] ss:$8 sps:$4 sm:$0xff]  }
  0x46   :  { %v444_v48 = vsel %vm285_vm2, 16843009, %v2688_v47  ;;  %v445_v50 = vsel %vm286_vm3, 16843009, %v2688_v47  ;;  %v2484_v23 = vld [vmem:[%s3429_s5 + $0x10] ss:$8 sps:$4 sm:$0xff]  }
  0x47   :  { %v446_v49 = vunpack.c.0.s8 %v444_v48  ;;  %v447_v53 = vunpack.c.0.s8 %v445_v50  ;;  %v2489_v24 = vld [vmem:[%s3429_s5 + $0x24] ss:$8 sps:$4 sm:$0xff]   ;;  %v2487_v25 = vld [vmem:[%s3429_s5 + $0x20] ss:$8 sps:$4 sm:$0xff]   ;;  %v2490_v26 = vld [vmem:[%s3429_s5 + $0x30] ss:$8 sps:$4 sm:$0xff]  }
  0x48   :  { %v2492_v27 = vld [vmem:[%s3429_s5 + $0x34] ss:$8 sps:$4 sm:$0xff]   ;;  %v2493_v46 = vld [vmem:[%s3431_s7 + $0x40] sm:$0xff]   ;;  %v2505_v50 = vld [vmem:[%s3430_s6 + $0x48] sm:$0xff]   ;;  %vm1283_vm11 = vcmask 130048  }
  0x49   :  { %vm2899_vm4 = vcmp.ne.s32.totalorder %v446_v49, 0  ;;  %vm2906_vm6 = vcmp.ne.s32.totalorder %v447_v53, 0  ;;  %2313 = vmatprep.subr.bf16.mxu0 %v2493_v46  ;;  %v2502_v48 = vld [vmem:[%s3430_s6] sm:$0xff]   ;;  %v2497_v49 = vld [vmem:[%s3431_s7 + $0x50] sm:$0xff]   ;;  %v2499_v53 = vld [vmem:[%s3431_s7 + $0x58] sm:$0xff]  }
  0x4a   :  { %v2498_v52 = vld [vmem:[%s3431_s7 + $0x10] sm:$0xff]  }
 0x115   :  { %v274_v39 = vpop.f32.mrb[0].mxu0 }
 0x116   :  { %288 = vrot.lane.b32.xlu0 %v274_v39, %s2687_s4  ;;  %v276_v40 = vpop.f32.mrb[1].mxu0 }
 0x117   :  { %v278_v41 = vpop.f32.mrb[2].mxu0 }
 0x118   :  { %v2877_v42 = vpop.f32.mrb[3].mxu0 }
 0x11a   :  { %366 = vrot.lane.b32.xlu0 %v278_v41, %s2687_s4 }
 0x188   :  { %v289_v43 = vpop.permute.xlu0 %288 }
 0x189   :  { %2354 = vmatpush3.xpose.msk.msra.mxu1 %vm290_vm1, %v289_v43 }
 0x18a   :  { %2358 = vmatprep.subr.mxu1 %v2685_v38 }
 0x18c   :  { %2356 = vmatmul.mubr.msk.f32.vlgmr.msra.gmra.mrb[0].mxu1 %vm290_vm1, %v274_v39  ;;  %v367_v44 = vpop.permute.xlu0 %366 }
 0x18d   :  { %2359 = vmatpush3.xpose.msk.msra.mxu1 %vm290_vm1, %v367_v44  ;;  %2360 = vmatprep.mubr.msk.f32.mxu1 %vm2686_vm0, %v2685_v38 }
 0x18e   :  { %2363 = vmatprep.subr.mxu1 %v2685_v38 }
 0x190   :  { %2361 = vmatmul.mubr.msk.f32.vlgmr.msra.gmra.mrb[2].mxu1 %vm290_vm1, %v278_v41 }
 0x191   :  { %2364 = vmatpush3.msra.mxu1 %v276_v40  ;;  %2365 = vmatprep.mubr.msk.f32.mxu1 %vm2686_vm0, %v2685_v38 }
 0x192   :  { %2368 = vmatprep.subr.mxu1 %v2685_v38 }
 0x25f   :  { %v361_v51 = vpop.f32.mrb[0].mxu1 }
 0x260   :  { %v442_v54 = vmul.f32 0.125, %v361_v51  ;;  %v2357_v55 = vpop.f32.mrb[1].mxu1  ;;  %v2506_v51 = vld [vmem:[%s3430_s6 + $0x8] sm:$0xff]  }
 0x261   :  { %v2503_v55 = vld [vmem:[%s3431_s7 + $0x60] sm:$0xff]  }
 0x262   :  { %v450_v56 = vsel %vm2899_vm4, -1e+09, %v442_v54  ;;  %v2500_v54 = vld [vmem:[%s3431_s7 + $0x18] sm:$0xff]  }
 0x263   :  { %v438_v57 = vpop.f32.mrb[2].mxu1  ;;  %v453_v58 = vsel %vm452_vm5, %v450_v56, -inf }
 0x264   :  { %v443_v60 = vmul.f32 0.125, %v438_v57  ;;  %454 = vmax.xlane.f32.xlu1 %v453_v58  ;;  %v2362_v61 = vpop.f32.mrb[3].mxu1  ;;  %v2507_v57 = vld [vmem:[%s3431_s7 + $0x68] sm:$0xff]  }
 0x265   :  { %v2508_v58 = vld [vmem:[%s3431_s7 + $0x28] sm:$0xff]  }
 0x266   :  { %v451_v62 = vsel %vm2906_vm6, -1e+09, %v443_v60 }
 0x267   :  { %v456_v63 = vsel %vm452_vm5, %v451_v62, -inf }
 0x268   :  { %457 = vmax.xlane.f32.xlu1 %v456_v63 }
 0x2f1   :  { %v455_v0 = vpop.xlane.xlu1 %454 }
 0x2f2   :  { %v459_v1 = vsub.f32 %v450_v56, %v455_v0  ;;  %v2504_v56 = vld [vmem:[%s3431_s7 + $0x20] sm:$0xff]  }
 0x2f4   :  { %v461_v2 = vmul.f32 1.442695, %v459_v1 }
 0x2f5   :  { %v458_v3 = vpop.xlane.xlu1 %457 }
 0x2f6   :  { %2633 = vpow2.f32 %v461_v2  ;;  %v460_v4 = vsub.f32 %v451_v62, %v458_v3 }
 0x2f8   :  { %v463_v5 = vmul.f32 1.442695, %v460_v4 }
 0x2fa   :  { %2635 = vpow2.f32 %v463_v5 }
 0x300   :  { %v2634_v6 = vpop.eup %2633 }
 0x301   :  { %v465_v7 = vsel %vm452_vm5, %v2634_v6, 0.0 }
 0x302   :  { %466 = vadd.xlane.f32.xlu0 %v465_v7 }
 0x304   :  { %v2636_v8 = vpop.eup %2635 }
 0x305   :  { %v468_v9 = vsel %vm452_vm5, %v2636_v8, 0.0 }
 0x306   :  { %469 = vadd.xlane.f32.xlu1 %v468_v9  ;;  %v2509_v9 = vld [vmem:[%s3430_s6 + $0x50] sm:$0xff]  }
 0x38f   :  { %v467_v10 = vpop.xlane.xlu0 %466 }
 0x390   :  { %2637 = vrcp.f32 %v467_v10  ;;  %v2510_v10 = vld [vmem:[%s3430_s6 + $0x10] sm:$0xff]  }
 0x393   :  { %v470_v11 = vpop.xlane.xlu1 %469 }
 0x394   :  { %2639 = vrcp.f32 %v470_v11  ;;  %v2511_v11 = vld [vmem:[%s3431_s7 + $0x70] sm:$0xff]  }
 0x39a   :  { %v2638_v12 = vpop.eup %2637 }
 0x39b   :  { %v473_v15 = vmul.f32 %v2638_v12, %v2634_v6  ;;  %v2512_v12 = vld [vmem:[%s3431_s7 + $0x30] sm:$0xff]  }
 0x39d   :  { %v475_v17 = vsel %vm2899_vm4, 0.0, %v473_v15  ;;  %v2513_v15 = vld [vmem:[%s3430_s6 + $0x58] sm:$0xff]  }
 0x39e   :  { %v2640_v18 = vpop.eup %2639  ;;  %2366 = vmatmul.mubr.msk.f32.vlgmr.msra.gmra.mrb[4].mxu1 %vm452_vm5, %v475_v17  ;;  %v2515_v17 = vld [vmem:[%s3431_s7 + $0x78] sm:$0xff]  }
 0x39f   :  { %2369 = vmatpush3.msra.mxu1 %v2877_v42  ;;  %2370 = vmatprep.mubr.msk.f32.mxu1 %vm2686_vm0, %v2685_v38  ;;  %v474_v19 = vmul.f32 %v2640_v18, %v2636_v8  ;;  %v2516_v18 = vld [vmem:[%s3431_s7 + $0x38] sm:$0xff]  }
 0x3a0   :  { %675 = vmatprep.subr.bf16.mxu1 %v2483_v16  ;;  %v2514_v16 = vld [vmem:[%s3430_s6 + $0x18] sm:$0xff]  }
 0x3a1   :  { %v476_v22 = vsel %vm2906_vm6, 0.0, %v474_v19  ;;  %v752_v19 = vld [vmem:[%s3425_s1 + $0x8] sm:$0xff] }
 0x3a2   :  { %2371 = vmatmul.mubr.msk.f32.vlgmr.msra.gmra.mrb[6].mxu1 %vm452_vm5, %v476_v22 }
 0x3a3   :  { %676 = vmatpush1.bf16.msra.mxu1 %v2481_v20  ;;  %707 = vmatprep.mubr.bf16.mxu1 %v2688_v47  ;;  %v754_v20 = vld [vmem:[%s3425_s1 + $0x18] sm:$0xff] }
 0x3a4   :  { %677 = vmatprep.subr.bf16.mxu1 %v2486_v21  ;;  %v2517_v21 = vld [vmem:[%s3430_s6 + $0x60] sm:$0xff]   ;;  %v931_v22 = vpack.c.bf16 %v754_v20, %v752_v19 }
 0x3a6   :  { %1094 = vmatprep.mubr.bf16.mxu0 %v931_v22 }
 0x3a7   :  { %678 = vmatpush1.bf16.msra.mxu1 %v2484_v23  ;;  %v751_v23 = vld [vmem:[%s3425_s1] sm:$0xff] }
 0x3a8   :  { %679 = vmatprep.subr.bf16.mxu1 %v2489_v24  ;;  %v753_v24 = vld [vmem:[%s3425_s1 + $0x10] sm:$0xff] }
 0x3ab   :  { %680 = vmatpush1.bf16.msra.mxu1 %v2487_v25  ;;  %v2518_v25 = vld [vmem:[%s3430_s6 + $0x20] sm:$0xff]  }
 0x3ac   :  { %681 = vmatprep.subr.bf16.mxu1 %v2492_v27  ;;  %v2519_v27 = vld [vmem:[%s3430_s6 + $0x68] sm:$0xff]  }
 0x3af   :  { %682 = vmatpush1.bf16.msra.mxu1 %v2490_v26  ;;  %v930_v26 = vpack.c.bf16 %v753_v24, %v751_v23 }
 0x471   :  { %v546_v28 = vpop.f32.mrb[4].mxu1 }
 0x472   :  { %v2367_v29 = vpop.f32.mrb[5].mxu1 }
 0x473   :  { %v2520_v29 = vld [vmem:[%s3430_s6 + $0x28] sm:$0xff]  }
 0x475   :  { %v619_v30 = vpop.f32.mrb[6].mxu1 }
 0x476   :  { %v623_v31 = vpack.c.bf16 %v619_v30, %v546_v28  ;;  %v2372_v32 = vpop.f32.mrb[7].mxu1  ;;  %v756_v28 = vld [vmem:[%s3425_s1 + $0x28] sm:$0xff]  ;;  %v758_v30 = vld [vmem:[%s3425_s1 + $0x38] sm:$0xff] }
 0x477   :  { %v933_v32 = vpack.c.bf16 %v758_v30, %v756_v28  ;;  %v2554_v28 = vld [vmem:[%s3433_s9 + $0x54] ss:$8 sps:$4 sm:$0xff]  }
 0x478   :  { %2169 = vmatmul.mubr.msk.bf16.vlgmr.msra.gmra.mrb[8].mxu1 %vm290_vm1, %v623_v31  ;;  %v2521_v31 = vld [vmem:[%s3430_s6 + $0x70] sm:$0xff]  }
 0x54b   :  { %v709_v33 = vpop.f32.mrb[8].mxu1 }
 0x54c   :  { %v710_v34 = vadd.f32 %v709_v33, %v2864_v35  ;;  %v711_v37 = vpop.f32.mrb[9].mxu1  ;;  %v2494_v35 = vld [vmem:[%s3431_s7] sm:$0xff]  }
 0x54d   :  { %v712_v39 = vadd.f32 %v711_v37, %v2795_v13  ;;  %v713_v40 = vpop.f32.mrb[10].mxu1  ;;  %v2495_v13 = vld [vmem:[%s3431_s7 + $0x48] sm:$0xff]   ;;  %2314 = vmatpush3.bf16.msra.mxu0 %v2494_v35  ;;  %v755_v33 = vld [vmem:[%s3425_s1 + $0x20] sm:$0xff]  ;;  %v2522_v37 = vld [vmem:[%s3430_s6 + $0x30] sm:$0xff]  }
 0x54e   :  { %v715_v41 = vpop.f32.mrb[11].mxu1  ;;  %v714_v42 = vadd.f32 %v713_v40, %v2869_v36  ;;  %v2496_v36 = vld [vmem:[%s3431_s7 + $0x8] sm:$0xff]   ;;  %2315 = vmatprep.subr.bf16.mxu0 %v2495_v13  ;;  %v2523_v40 = vld [vmem:[%s3430_s6 + $0x78] sm:$0xff]  }
 0x54f   :  { %v716_v43 = vadd.f32 %v715_v41, %v2800_v14  ;;  %v718_v44 = vadd.f32 %v712_v39, %v710_v34  ;;  %v2501_v14 = vld [vmem:[%s3430_s6 + $0x40] sm:$0xff]   ;;  %v2524_v41 = vld [vmem:[%s3430_s6 + $0x38] sm:$0xff]  }
 0x550   :  { %2291 = vmatprep.subr.bf16.mxu1 %v2501_v14 }
 0x551   :  { %719 = vadd.xlane.f32.xlu1 %v718_v44  ;;  %v721_v45 = vadd.f32 %v716_v43, %v714_v42  ;;  %2292 = vmatpush3.bf16.msra.mxu1 %v2502_v48 }
 0x552   :  { %2293 = vmatprep.subr.bf16.mxu1 %v2505_v50  ;;  %2316 = vmatpush3.bf16.msra.mxu0 %v2496_v36 }
 0x553   :  { %2317 = vmatprep.subr.bf16.mxu0 %v2497_v49 }
 0x555   :  { %722 = vadd.xlane.f32.xlu1 %v721_v45  ;;  %2294 = vmatpush3.bf16.msra.mxu1 %v2506_v51 }
 0x556   :  { %2318 = vmatpush3.bf16.msra.mxu0 %v2498_v52  ;;  %2295 = vmatprep.subr.bf16.mxu1 %v2509_v9 }
 0x557   :  { %2319 = vmatprep.subr.bf16.mxu0 %v2499_v53 }
 0x559   :  { %2296 = vmatpush3.bf16.msra.mxu1 %v2510_v10 }
 0x55a   :  { %2320 = vmatpush3.bf16.msra.mxu0 %v2500_v54  ;;  %2297 = vmatprep.subr.bf16.mxu1 %v2513_v15  ;;  %v1111_v15 = vld [vmem:[%s3427_s3] sm:$0x3] }
 0x55b   :  { %2321 = vmatprep.subr.bf16.mxu0 %v2503_v55  ;;  %vm1113_vm8 = vnez %v1111_v15 }
 0x55d   :  { %2298 = vmatpush3.bf16.msra.mxu1 %v2514_v16  ;;  %v1275_v16 = vsel %vm1113_vm8, 16843009, %v2688_v47 }
 0x55e   :  { %2322 = vmatpush3.bf16.msra.mxu0 %v2504_v56  ;;  %2299 = vmatprep.subr.bf16.mxu1 %v2517_v21 }
 0x55f   :  { %2323 = vmatprep.subr.bf16.mxu0 %v2507_v57 }
 0x561   :  { %2300 = vmatpush3.bf16.msra.mxu1 %v2518_v25 }
 0x562   :  { %2324 = vmatpush3.bf16.msra.mxu0 %v2508_v58  ;;  %2301 = vmatprep.subr.bf16.mxu1 %v2519_v27 }
 0x563   :  { %2325 = vmatprep.subr.bf16.mxu0 %v2511_v11 }
 0x565   :  { %2302 = vmatpush3.bf16.msra.mxu1 %v2520_v29 }
 0x566   :  { %2326 = vmatpush3.bf16.msra.mxu0 %v2512_v12  ;;  %2303 = vmatprep.subr.bf16.mxu1 %v2521_v31 }
 0x567   :  { %2327 = vmatprep.subr.bf16.mxu0 %v2515_v17  ;;  %v1112_v17 = vld [vmem:[%s3427_s3 + $0x2] sm:$0x3] }
 0x568   :  { %vm1114_vm9 = vnez %v1112_v17 }
 0x569   :  { %2304 = vmatpush3.bf16.msra.mxu1 %v2522_v37  ;;  %v1276_v23 = vsel %vm1114_vm9, 16843009, %v2688_v47 }
 0x56a   :  { %2328 = vmatpush3.bf16.msra.mxu0 %v2516_v18  ;;  %2305 = vmatprep.subr.bf16.mxu1 %v2523_v40  ;;  %v1277_v18 = vunpack.c.0.s8 %v1275_v16 }
 0x56c   :  { %vm3142_vm10 = vcmp.ne.s32.totalorder %v1277_v18, 0 }
 0x56d   :  { %1095 = vmatmul.mubr.bf16.vlgmr.msra.gmra.mrb[4].mxu0 %v930_v26  ;;  %2306 = vmatpush3.bf16.msra.mxu1 %v2524_v41  ;;  %v1278_v26 = vunpack.c.0.s8 %v1276_v23  ;;  %v2543_v23 = vld [vmem:[%s3433_s9 + $0x20] ss:$8 sps:$4 sm:$0xff]  }
 0x56e   :  { %1102 = vmatprep.mubr.bf16.mxu0 %v933_v32 }
 0x56f   :  { %vm3150_vm12 = vcmp.ne.s32.totalorder %v1278_v26, 0  ;;  %v2551_v26 = vld [vmem:[%s3433_s9 + $0x44] ss:$8 sps:$4 sm:$0xff]  }
 0x5de   :  { %v720_v59 = vpop.xlane.xlu1 %719 }
 0x5df   :  { %v725_v60 = vmul.f32 0.00390625, %v720_v59 }
 0x5e1   :  { %v3002_v61 = vsub.f32 %v710_v34, %v725_v60  ;;  %v3004_v62 = vsub.f32 %v712_v39, %v725_v60  ;;  %v757_v34 = vld [vmem:[%s3425_s1 + $0x30] sm:$0xff]  ;;  %v2527_v60 = vld [vmem:[%s3432_s8 + $0x4] ss:$8 sps:$4 sm:$0xff]  }
 0x5e2   :  { %v723_v63 = vpop.xlane.xlu1 %722  ;;  %v932_v39 = vpack.c.bf16 %v757_v34, %v755_v33 }
 0x5e3   :  { %v726_v0 = vmul.f32 0.00390625, %v723_v63  ;;  %v731_v1 = vmul.f32 %v3002_v61, %v3002_v61  ;;  %v732_v2 = vmul.f32 %v3004_v62, %v3004_v62 }
 0x5e4   :  { %1103 = vmatmul.mubr.bf16.gmra.mrb[8].mxu0 %v932_v39 }
 0x5e5   :  { %v3010_v3 = vsub.f32 %v714_v42, %v726_v0  ;;  %v3012_v4 = vsub.f32 %v716_v43, %v726_v0  ;;  %v735_v5 = vadd.f32 %v732_v2, %v731_v1  ;;  %v2689_v42 = vmov 0.0|0.0  }
 0x5e6   :  { %2401 = vmatprep.subr.bf16.mxu1 %v2689_v42 }
 0x5e7   :  { %736 = vadd.xlane.f32.xlu1 %v735_v5  ;;  %v733_v6 = vmul.f32 %v3010_v3, %v3010_v3  ;;  %v734_v7 = vmul.f32 %v3012_v4, %v3012_v4 }
 0x5e9   :  { %v738_v8 = vadd.f32 %v734_v7, %v733_v6 }
 0x5eb   :  { %739 = vadd.xlane.f32.xlu1 %v738_v8 }
 0x640   :  { %v2329_v54 = vpop.f32.mrb[4].mxu0 }
 0x641   :  { %v2330_v55 = vpop.f32.mrb[5].mxu0 }
 0x642   :  { %v3109_v56 = vadd.f32 %v2330_v55, %v2329_v54  ;;  %v2332_v57 = vpop.f32.mrb[6].mxu0 }
 0x643   :  { %v2333_v58 = vpop.f32.mrb[7].mxu0 }
 0x644   :  { %v3111_v59 = vadd.f32 %v2333_v58, %v2332_v57 }
 0x674   :  { %v737_v43 = vpop.xlane.xlu1 %736 }
 0x675   :  { %v741_v44 = vmul.f32 0.00390625, %v737_v43 }
 0x677   :  { %v743_v45 = vadd.f32 1e-05, %v741_v44 }
 0x678   :  { %v740_v46 = vpop.xlane.xlu1 %739 }
 0x679   :  { %v742_v35 = vmul.f32 0.00390625, %v740_v46  ;;  %2641 = vrsqrt.f32 %v743_v45 }
 0x67b   :  { %v744_v13 = vadd.f32 1e-05, %v742_v35 }
 0x67d   :  { %2643 = vrsqrt.f32 %v744_v13 }
 0x683   :  { %v2642_v14 = vpop.eup %2641 }
 0x684   :  { %v3092_v48 = vmul.f32 %v2642_v14, %v3004_v62  ;;  %v3098_v50 = vmul.f32 %v2642_v14, %v3002_v61  ;;  %v2423_v61 = vpack.i.bf16 %v3111_v59, %v3109_v56  ;;  %v2402_v62 = vpack.c.bf16 %v3111_v59, %v3109_v56 }
 0x687   :  { %v2644_v36 = vpop.eup %2643 }
 0x688   :  { %v3095_v49 = vmul.f32 %v2644_v36, %v3012_v4  ;;  %v3101_v51 = vmul.f32 %v2644_v36, %v3010_v3 }
 0x68a   :  { %v760_v52 = vpack.c.bf16 %v3095_v49, %v3092_v48  ;;  %v759_v53 = vpack.c.bf16 %v3101_v51, %v3098_v50 }
 0x68c   :  { %921 = vmatprep.mubr.bf16.mxu1 %v760_v52 }
 0x68d   :  { %922 = vmatmul.mubr.bf16.vlgmr.msra.gmra.mrb[12].mxu1 %v759_v53 }
 0x68e   :  { %2377 = vmatprep.mubr.msk.f32.mxu1 %vm2686_vm0, %v2685_v38  ;;  %2404 = vmatpush3.bf16.xpose.msk.msra.mxu1 %vm3115_vm7, %v2402_v62 }
 0x68f   :  { %2405 = vmatprep.subr.bf16.mxu1 %v2689_v42 }
 0x6b7   :  { %v2335_v63 = vpop.f32.mrb[8].mxu0 }
 0x6b8   :  { %v2336_v0 = vpop.f32.mrb[9].mxu0 }
 0x6b9   :  { %v2337_v1 = vadd.f32 %v2336_v0, %v2335_v63  ;;  %v2338_v2 = vpop.f32.mrb[10].mxu0  ;;  %v2525_v63 = vld [vmem:[%s3432_s8] ss:$8 sps:$4 sm:$0xff]   ;;  %v2530_v0 = vld [vmem:[%s3432_s8 + $0x14] ss:$8 sps:$4 sm:$0xff]  }
 0x6ba   :  { %v2339_v3 = vpop.f32.mrb[11].mxu0 }
 0x6bb   :  { %v2340_v4 = vadd.f32 %v2339_v3, %v2338_v2  ;;  %v2531_v2 = vld [vmem:[%s3432_s8 + $0x20] ss:$8 sps:$4 sm:$0xff]   ;;  %v2533_v3 = vld [vmem:[%s3432_s8 + $0x24] ss:$8 sps:$4 sm:$0xff]  }
 0x6bd   :  { %v2428_v5 = vpack.i.bf16 %v2340_v4, %v2337_v1  ;;  %v2406_v6 = vpack.c.bf16 %v2340_v4, %v2337_v1  ;;  %v2536_v4 = vld [vmem:[%s3432_s8 + $0x34] ss:$8 sps:$4 sm:$0xff]  }
 0x760   :  { %v2307_v7 = vpop.f32.mrb[12].mxu1 }
 0x761   :  { %v2308_v8 = vpop.f32.mrb[13].mxu1 }
 0x762   :  { %v2309_v9 = vadd.f32 %v2308_v8, %v2307_v7  ;;  %v2310_v10 = vpop.f32.mrb[14].mxu1 }
 0x763   :  { %v2311_v11 = vpop.f32.mrb[15].mxu1 }
 0x764   :  { %v2312_v12 = vadd.f32 %v2311_v11, %v2310_v10  ;;  %2378 = vmatmul.mubr.msk.f32.vlgmr.msra.gmra.mrb[16].mxu1 %vm290_vm1, %v2309_v9 }
 0x765   :  { %2408 = vmatpush3.bf16.xpose.msk.msra.mxu1 %vm3115_vm7, %v2406_v6  ;;  %2384 = vmatprep.mubr.msk.f32.mxu1 %vm2686_vm0, %v2685_v38 }
 0x766   :  { %2409 = vmatprep.subr.bf16.mxu1 %v2689_v42 }
 0x76c   :  { %2385 = vmatmul.mubr.msk.f32.vlgmr.msra.gmra.mrb[18].mxu1 %vm290_vm1, %v2312_v12 }
 0x76d   :  { %2391 = vmatprep.mubr.msk.f32.mxu1 %vm2686_vm0, %v2685_v38 }
 0x837   :  { %v1190_v19 = vpop.f32.mrb[16].mxu1 }
 0x838   :  { %v1273_v21 = vmul.f32 0.125, %v1190_v19  ;;  %v2379_v22 = vpop.f32.mrb[17].mxu1 }
 0x839   :  { %v2537_v22 = vld [vmem:[%s3433_s9] ss:$8 sps:$4 sm:$0xff]  }
 0x83a   :  { %v1281_v24 = vsel %vm3142_vm10, -1e+09, %v1273_v21 }
 0x83b   :  { %v1284_v25 = vsel %vm1283_vm11, %v1281_v24, -inf }
 0x83c   :  { %1285 = vmax.xlane.f32.xlu1 %v1284_v25  ;;  %v2546_v25 = vld [vmem:[%s3433_s9 + $0x30] ss:$8 sps:$4 sm:$0xff]  }
 0x83f   :  { %v1269_v27 = vpop.f32.mrb[18].mxu1 }
 0x840   :  { %v1274_v29 = vmul.f32 0.125, %v1269_v27  ;;  %v2386_v30 = vpop.f32.mrb[19].mxu1  ;;  %v2549_v27 = vld [vmem:[%s3433_s9 + $0x40] ss:$8 sps:$4 sm:$0xff]  }
 0x841   :  { %v2557_v30 = vld [vmem:[%s3433_s9 + $0x64] ss:$8 sps:$4 sm:$0xff]  }
 0x842   :  { %v1282_v31 = vsel %vm3150_vm12, -1e+09, %v1274_v29  ;;  %v2552_v29 = vld [vmem:[%s3433_s9 + $0x50] ss:$8 sps:$4 sm:$0xff]  }
 0x843   :  { %v1287_v32 = vsel %vm1283_vm11, %v1282_v31, -inf }
 0x844   :  { %1288 = vmax.xlane.f32.xlu1 %v1287_v32  ;;  %v2560_v32 = vld [vmem:[%s3433_s9 + $0x74] ss:$8 sps:$4 sm:$0xff]  }
 0x8c9   :  { %v1286_v33 = vpop.xlane.xlu1 %1285 }
 0x8ca   :  { %v1290_v34 = vsub.f32 %v1281_v24, %v1286_v33  ;;  %v2548_v24 = vld [vmem:[%s3433_s9 + $0x34] ss:$8 sps:$4 sm:$0xff]   ;;  %v2558_v33 = vld [vmem:[%s3433_s9 + $0x70] ss:$8 sps:$4 sm:$0xff]  }
 0x8cc   :  { %v1292_v37 = vmul.f32 1.442695, %v1290_v34  ;;  %v2563_v34 = vld [vmem:[%s3433_s9 + $0x84] ss:$8 sps:$4 sm:$0xff]  }
 0x8ce   :  { %2645 = vpow2.f32 %v1292_v37  ;;  %v2561_v37 = vld [vmem:[%s3433_s9 + $0x80] ss:$8 sps:$4 sm:$0xff]  }
 0x8d1   :  { %v1289_v39 = vpop.xlane.xlu1 %1288 }
 0x8d2   :  { %v1291_v40 = vsub.f32 %v1282_v31, %v1289_v39  ;;  %v2555_v31 = vld [vmem:[%s3433_s9 + $0x60] ss:$8 sps:$4 sm:$0xff]   ;;  %v2566_v39 = vld [vmem:[%s3433_s9 + $0x94] ss:$8 sps:$4 sm:$0xff]  }
 0x8d4   :  { %v1294_v41 = vmul.f32 1.442695, %v1291_v40  ;;  %v2564_v40 = vld [vmem:[%s3433_s9 + $0x90] ss:$8 sps:$4 sm:$0xff]  }
 0x8d6   :  { %2647 = vpow2.f32 %v1294_v41  ;;  %v2569_v41 = vld [vmem:[%s3433_s9 + $0xa4] ss:$8 sps:$4 sm:$0xff]  }
 0x8d8   :  { %v2646_v43 = vpop.eup %2645 }
 0x8d9   :  { %v1296_v44 = vsel %vm1283_vm11, %v2646_v43, 0.0 }
 0x8da   :  { %1297 = vadd.xlane.f32.xlu1 %v1296_v44 }
 0x8e0   :  { %v2648_v45 = vpop.eup %2647 }
 0x8e1   :  { %v1299_v46 = vsel %vm1283_vm11, %v2648_v45, 0.0 }
 0x8e2   :  { %1300 = vadd.xlane.f32.xlu0 %v1299_v46 }
 0x8eb   :  { %2424 = vrot.lane.b32.xlu1 %v2423_v61, %s2687_s4 }
 0x8f8   :  { %2429 = vrot.lane.b32.xlu0 %v2428_v5, %s2687_s4 }
 0x967   :  { %v1298_v35 = vpop.xlane.xlu1 %1297 }
 0x968   :  { %2649 = vrcp.f32 %v1298_v35 }
 0x96b   :  { %v2425_v13 = vpop.permute.xlu1 %2424 }
 0x96c   :  { %v2427_v14 = vunpack.i.h.bf16 %v2425_v13  ;;  %v2426_v36 = vunpack.i.l.bf16 %v2425_v13 }
 0x96e   :  { %v2410_v52 = vpack.c.bf16 %v2427_v14, %v2426_v36 }
 0x96f   :  { %v1301_v53 = vpop.xlane.xlu0 %1300 }
 0x970   :  { %2651 = vrcp.f32 %v1301_v53  ;;  %2411 = vmatpush3.bf16.msra.mxu1 %v2410_v52 }
 0x971   :  { %2412 = vmatprep.subr.bf16.mxu1 %v2689_v42 }
 0x972   :  { %v2650_v54 = vpop.eup %2649 }
 0x973   :  { %v2430_v55 = vpop.permute.xlu0 %2429  ;;  %v1304_v56 = vmul.f32 %v2650_v54, %v2646_v43  ;;  %v2567_v43 = vld [vmem:[%s3433_s9 + $0xa0] ss:$8 sps:$4 sm:$0xff]  }
 0x974   :  { %v2432_v57 = vunpack.i.h.bf16 %v2430_v55  ;;  %v2431_v58 = vunpack.i.l.bf16 %v2430_v55 }
 0x975   :  { %v1306_v59 = vsel %vm3142_vm10, 0.0, %v1304_v56 }
 0x976   :  { %v2413_v61 = vpack.c.bf16 %v2432_v57, %v2431_v58  ;;  %2392 = vmatmul.mubr.msk.f32.vlgmr.msra.gmra.mrb[20].mxu1 %vm1283_vm11, %v1306_v59  ;;  %v2572_v59 = vld [vmem:[%s3433_s9 + $0xb4] ss:$8 sps:$4 sm:$0xff]  }
 0x977   :  { %2398 = vmatprep.mubr.msk.f32.mxu1 %vm2686_vm0, %v2685_v38  ;;  %v2528_v38 = vld [vmem:[%s3432_s8 + $0x10] ss:$8 sps:$4 sm:$0xff]  }
 0x978   :  { %2414 = vmatpush3.bf16.msra.mxu1 %v2413_v61  ;;  %v2575_v61 = vld [vmem:[%s3433_s9 + $0xc4] ss:$8 sps:$4 sm:$0xff]  }
 0x979   :  { %1518 = vmatprep.subr.bf16.mxu1 %v2527_v60  ;;  %v2570_v60 = vld [vmem:[%s3433_s9 + $0xb0] ss:$8 sps:$4 sm:$0xff]  }
 0x97a   :  { %v2652_v42 = vpop.eup %2651 }
 0x97b   :  { %v1305_v62 = vmul.f32 %v2652_v42, %v2648_v45  ;;  %v2573_v42 = vld [vmem:[%s3433_s9 + $0xc0] ss:$8 sps:$4 sm:$0xff]  }
 0x97d   :  { %v1307_v1 = vsel %vm3150_vm12, 0.0, %v1305_v62  ;;  %v2578_v62 = vld [vmem:[%s3433_s9 + $0xd4] ss:$8 sps:$4 sm:$0xff]  }
 0x97e   :  { %2399 = vmatmul.mubr.msk.f32.vlgmr.msra.gmra.mrb[22].mxu1 %vm1283_vm11, %v1307_v1  ;;  %v2579_v1 = vld [vmem:[%s3433_s9 + $0xe0] ss:$8 sps:$4 sm:$0xff]  }
 0x97f   :  { %1519 = vmatpush1.bf16.msra.mxu1 %v2525_v63  ;;  %1550 = vmatprep.mubr.bf16.mxu1 %v2688_v47  ;;  %v2534_v47 = vld [vmem:[%s3432_s8 + $0x30] ss:$8 sps:$4 sm:$0xff]  }
 0x980   :  { %1520 = vmatprep.subr.bf16.mxu1 %v2530_v0  ;;  %v2576_v63 = vld [vmem:[%s3433_s9 + $0xd0] ss:$8 sps:$4 sm:$0xff]   ;;  %v2581_v0 = vld [vmem:[%s3433_s9 + $0xe4] ss:$8 sps:$4 sm:$0xff]  }
 0x983   :  { %1521 = vmatpush1.bf16.msra.mxu1 %v2528_v38  ;;  %v2584_v38 = vld [vmem:[%s3433_s9 + $0xf4] ss:$8 sps:$4 sm:$0xff]  }
 0x984   :  { %1522 = vmatprep.subr.bf16.mxu1 %v2533_v3  ;;  %v2585_v3 = vld [vmem:[%s3434_s10] ss:$8 sps:$4 sm:$0xff]  }
 0x987   :  { %1523 = vmatpush1.bf16.msra.mxu1 %v2531_v2  ;;  %v2582_v2 = vld [vmem:[%s3433_s9 + $0xf0] ss:$8 sps:$4 sm:$0xff]  }
 0x988   :  { %1524 = vmatprep.subr.bf16.mxu1 %v2536_v4  ;;  %v2587_v4 = vld [vmem:[%s3434_s10 + $0x4] ss:$8 sps:$4 sm:$0xff]  }
 0x98b   :  { %1525 = vmatpush1.bf16.msra.mxu1 %v2534_v47  ;;  %v2590_v47 = vld [vmem:[%s3434_s10 + $0x14] ss:$8 sps:$4 sm:$0xff]  }
 0x98c   :  { %2028 = vmatprep.subr.bf16.mxu1 %v2587_v4 }
 0xa49   :  { %v1383_v5 = vpop.f32.mrb[20].mxu1 }
 0xa4a   :  { %v2393_v6 = vpop.f32.mrb[21].mxu1 }
 0xa4b   :  { %v2593_v6 = vld [vmem:[%s3434_s10 + $0x24] ss:$8 sps:$4 sm:$0xff]  }
 0xa51   :  { %v1462_v7 = vpop.f32.mrb[22].mxu1 }
 0xa52   :  { %v1466_v8 = vpack.c.bf16 %v1462_v7, %v1383_v5  ;;  %v2400_v9 = vpop.f32.mrb[23].mxu1  ;;  %v2588_v5 = vld [vmem:[%s3434_s10 + $0x10] ss:$8 sps:$4 sm:$0xff]   ;;  %v2591_v7 = vld [vmem:[%s3434_s10 + $0x20] ss:$8 sps:$4 sm:$0xff]  }
 0xa53   :  { %v2594_v9 = vld [vmem:[%s3434_s10 + $0x30] ss:$8 sps:$4 sm:$0xff]  }
 0xa54   :  { %2218 = vmatmul.mubr.msk.bf16.vlgmr.msra.gmra.mrb[24].mxu1 %vm290_vm1, %v1466_v8  ;;  %v2596_v8 = vld [vmem:[%s3434_s10 + $0x34] ss:$8 sps:$4 sm:$0xff]  }
 0xa55   :  { %2029 = vmatpush1.bf16.msra.mxu1 %v2585_v3 }
 0xa56   :  { %2030 = vmatprep.subr.bf16.mxu1 %v2590_v47 }
 0xa59   :  { %2031 = vmatpush1.bf16.msra.mxu1 %v2588_v5 }
 0xa5a   :  { %2032 = vmatprep.subr.bf16.mxu1 %v2593_v6 }
 0xa5d   :  { %2033 = vmatpush1.bf16.msra.mxu1 %v2591_v7 }
 0xa5e   :  { %2034 = vmatprep.subr.bf16.mxu1 %v2596_v8 }
 0xa61   :  { %2035 = vmatpush1.bf16.msra.mxu1 %v2594_v9 }
 0xb27   :  { %v1552_v10 = vpop.f32.mrb[24].mxu1 }
 0xb28   :  { %v1553_v11 = vadd.f32 %v1552_v10, %v3098_v50  ;;  %v1554_v12 = vpop.f32.mrb[25].mxu1  ;;  %v2539_v50 = vld [vmem:[%s3433_s9 + $0x4] ss:$8 sps:$4 sm:$0xff]  }
 0xb29   :  { %v1555_v15 = vadd.f32 %v1554_v12, %v3092_v48  ;;  %v1556_v16 = vpop.f32.mrb[26].mxu1  ;;  %v2542_v48 = vld [vmem:[%s3433_s9 + $0x14] ss:$8 sps:$4 sm:$0xff]   ;;  %1787 = vmatprep.subr.bf16.mxu0 %v2539_v50  ;;  %v2599_v10 = vld [vmem:[%s3434_s10 + $0x44] ss:$8 sps:$4 sm:$0xff]  }
 0xb2a   :  { %v1557_v17 = vadd.f32 %v1556_v16, %v3101_v51  ;;  %v1558_v18 = vpop.f32.mrb[27].mxu1  ;;  %1788 = vmatpush1.bf16.msra.mxu0 %v2537_v22  ;;  %v2545_v51 = vld [vmem:[%s3433_s9 + $0x24] ss:$8 sps:$4 sm:$0xff]   ;;  %2036 = vmatprep.subr.bf16.mxu1 %v2599_v10  ;;  %v2602_v12 = vld [vmem:[%s3434_s10 + $0x54] ss:$8 sps:$4 sm:$0xff]  }
 0xb2b   :  { %v1559_v19 = vadd.f32 %v1558_v18, %v3095_v49  ;;  %v1561_v20 = vadd.f32 %v1555_v15, %v1553_v11  ;;  %v2540_v49 = vld [vmem:[%s3433_s9 + $0x10] ss:$8 sps:$4 sm:$0xff]   ;;  %1789 = vmatprep.subr.bf16.mxu0 %v2542_v48  ;;  %v2605_v16 = vld [vmem:[%s3434_s10 + $0x64] ss:$8 sps:$4 sm:$0xff]   ;;  %v2608_v18 = vld [vmem:[%s3434_s10 + $0x74] ss:$8 sps:$4 sm:$0xff]  }
 0xb2c   :  { %v2614_v22 = vld [vmem:[%s3434_s10 + $0x94] ss:$8 sps:$4 sm:$0xff]   ;;  %v2612_v50 = vld [vmem:[%s3434_s10 + $0x90] ss:$8 sps:$4 sm:$0xff]   ;;  %v2617_v48 = vld [vmem:[%s3434_s10 + $0xa4] ss:$8 sps:$4 sm:$0xff]  }
 0xb2d   :  { %1562 = vadd.xlane.f32.xlu1 %v1561_v20  ;;  %v1564_v21 = vadd.f32 %v1559_v19, %v1557_v17  ;;  %v2611_v20 = vld [vmem:[%s3434_s10 + $0x84] ss:$8 sps:$4 sm:$0xff]  }
 0xb2e   :  { %1790 = vmatpush1.bf16.msra.mxu0 %v2540_v49  ;;  %v2615_v49 = vld [vmem:[%s3434_s10 + $0xa0] ss:$8 sps:$4 sm:$0xff]  }
 0xb2f   :  { %1565 = vadd.xlane.f32.xlu0 %v1564_v21  ;;  %1791 = vmatprep.subr.bf16.mxu0 %v2545_v51  ;;  %v2609_v21 = vld [vmem:[%s3434_s10 + $0x80] ss:$8 sps:$4 sm:$0xff]   ;;  %v2620_v51 = vld [vmem:[%s3434_s10 + $0xb4] ss:$8 sps:$4 sm:$0xff]  }
 0xb32   :  { %1792 = vmatpush1.bf16.msra.mxu0 %v2543_v23  ;;  %v2618_v23 = vld [vmem:[%s3434_s10 + $0xb0] ss:$8 sps:$4 sm:$0xff]  }
 0xb33   :  { %1793 = vmatprep.subr.bf16.mxu0 %v2548_v24  ;;  %v2623_v24 = vld [vmem:[%s3434_s10 + $0xc4] ss:$8 sps:$4 sm:$0xff]  }
 0xb36   :  { %1794 = vmatpush1.bf16.msra.mxu0 %v2546_v25  ;;  %v2621_v25 = vld [vmem:[%s3434_s10 + $0xc0] ss:$8 sps:$4 sm:$0xff]  }
 0xb37   :  { %1795 = vmatprep.subr.bf16.mxu0 %v2551_v26  ;;  %v2626_v26 = vld [vmem:[%s3434_s10 + $0xd4] ss:$8 sps:$4 sm:$0xff]  }
 0xb3a   :  { %1796 = vmatpush1.bf16.msra.mxu0 %v2549_v27  ;;  %v2624_v27 = vld [vmem:[%s3434_s10 + $0xd0] ss:$8 sps:$4 sm:$0xff]  }
 0xb3b   :  { %1797 = vmatprep.subr.bf16.mxu0 %v2554_v28 }
 0xb3e   :  { %1798 = vmatpush1.bf16.msra.mxu0 %v2552_v29 }
 0xb3f   :  { %1799 = vmatprep.subr.bf16.mxu0 %v2557_v30 }
 0xb42   :  { %1800 = vmatpush1.bf16.msra.mxu0 %v2555_v31 }
 0xb43   :  { %1801 = vmatprep.subr.bf16.mxu0 %v2560_v32 }
 0xb46   :  { %1802 = vmatpush1.bf16.msra.mxu0 %v2558_v33 }
 0xb47   :  { %1803 = vmatprep.subr.bf16.mxu0 %v2563_v34 }
 0xb4a   :  { %1804 = vmatpush1.bf16.msra.mxu0 %v2561_v37 }
 0xb4b   :  { %1805 = vmatprep.subr.bf16.mxu0 %v2566_v39 }
 0xb4e   :  { %1806 = vmatpush1.bf16.msra.mxu0 %v2564_v40 }
 0xb4f   :  { %1807 = vmatprep.subr.bf16.mxu0 %v2569_v41 }
 0xb52   :  { %1808 = vmatpush1.bf16.msra.mxu0 %v2567_v43 }
 0xb53   :  { %1809 = vmatprep.subr.bf16.mxu0 %v2572_v59 }
 0xb56   :  { %1810 = vmatpush1.bf16.msra.mxu0 %v2570_v60 }
 0xb57   :  { %1811 = vmatprep.subr.bf16.mxu0 %v2575_v61 }
 0xb5a   :  { %1812 = vmatpush1.bf16.msra.mxu0 %v2573_v42 }
 0xb5b   :  { %1813 = vmatprep.subr.bf16.mxu0 %v2578_v62 }
 0xb5e   :  { %1814 = vmatpush1.bf16.msra.mxu0 %v2576_v63 }
 0xb5f   :  { %1815 = vmatprep.subr.bf16.mxu0 %v2581_v0 }
 0xb62   :  { %1816 = vmatpush1.bf16.msra.mxu0 %v2579_v1 }
 0xb63   :  { %1817 = vmatprep.subr.bf16.mxu0 %v2584_v38 }
 0xb66   :  { %1818 = vmatpush1.bf16.msra.mxu0 %v2582_v2 }
 0xbba   :  { %v1563_v44 = vpop.xlane.xlu1 %1562 }
 0xbbb   :  { %v1567_v45 = vmul.f32 0.00390625, %v1563_v44 }
 0xbbc   :  { %v1566_v46 = vpop.xlane.xlu0 %1565 }
 0xbbd   :  { %v3266_v35 = vsub.f32 %v1553_v11, %v1567_v45  ;;  %v3268_v13 = vsub.f32 %v1555_v15, %v1567_v45  ;;  %v1568_v14 = vmul.f32 0.00390625, %v1566_v46  ;;  %v2597_v11 = vld [vmem:[%s3434_s10 + $0x40] ss:$8 sps:$4 sm:$0xff]   ;;  %v2600_v15 = vld [vmem:[%s3434_s10 + $0x50] ss:$8 sps:$4 sm:$0xff]  }
 0xbbe   :  { %2037 = vmatpush1.bf16.msra.mxu1 %v2597_v11  ;;  %v2629_v46 = vld [vmem:[%s3434_s10 + $0xe4] ss:$8 sps:$4 sm:$0xff]  }
 0xbbf   :  { %v3270_v36 = vsub.f32 %v1557_v17, %v1568_v14  ;;  %v3272_v52 = vsub.f32 %v1559_v19, %v1568_v14  ;;  %v1573_v53 = vmul.f32 %v3266_v35, %v3266_v35  ;;  %v1574_v54 = vmul.f32 %v3268_v13, %v3268_v13  ;;  %2038 = vmatprep.subr.bf16.mxu1 %v2602_v12  ;;  %v2603_v17 = vld [vmem:[%s3434_s10 + $0x60] ss:$8 sps:$4 sm:$0xff]   ;;  %v2606_v19 = vld [vmem:[%s3434_s10 + $0x70] ss:$8 sps:$4 sm:$0xff]  }
 0xbc0   :  { %v2627_v14 = vld [vmem:[%s3434_s10 + $0xe0] ss:$8 sps:$4 sm:$0xff]  }
 0xbc1   :  { %v1577_v55 = vadd.f32 %v1574_v54, %v1573_v53  ;;  %v1575_v56 = vmul.f32 %v3270_v36, %v3270_v36  ;;  %v1576_v57 = vmul.f32 %v3272_v52, %v3272_v52 }
 0xbc2   :  { %2039 = vmatpush1.bf16.msra.mxu1 %v2600_v15 }
 0xbc3   :  { %1578 = vadd.xlane.f32.xlu1 %v1577_v55  ;;  %v1580_v58 = vadd.f32 %v1576_v57, %v1575_v56  ;;  %2040 = vmatprep.subr.bf16.mxu1 %v2605_v16 }
 0xbc5   :  { %1581 = vadd.xlane.f32.xlu0 %v1580_v58 }
 0xbc6   :  { %2041 = vmatpush1.bf16.msra.mxu1 %v2603_v17 }
 0xbc7   :  { %2042 = vmatprep.subr.bf16.mxu1 %v2608_v18 }
 0xbca   :  { %2043 = vmatpush1.bf16.msra.mxu1 %v2606_v19 }
 0xbcb   :  { %2044 = vmatprep.subr.bf16.mxu1 %v2611_v20 }
 0xbce   :  { %2045 = vmatpush1.bf16.msra.mxu1 %v2609_v21 }
 0xbcf   :  { %2046 = vmatprep.subr.bf16.mxu1 %v2614_v22 }
 0xbd2   :  { %2047 = vmatpush1.bf16.msra.mxu1 %v2612_v50 }
 0xbd3   :  { %2048 = vmatprep.subr.bf16.mxu1 %v2617_v48 }
 0xbd6   :  { %2049 = vmatpush1.bf16.msra.mxu1 %v2615_v49 }
 0xbd7   :  { %2050 = vmatprep.subr.bf16.mxu1 %v2620_v51 }
 0xbda   :  { %2051 = vmatpush1.bf16.msra.mxu1 %v2618_v23 }
 0xbdb   :  { %2052 = vmatprep.subr.bf16.mxu1 %v2623_v24 }
 0xbde   :  { %2053 = vmatpush1.bf16.msra.mxu1 %v2621_v25 }
 0xbdf   :  { %2054 = vmatprep.subr.bf16.mxu1 %v2626_v26 }
 0xbe2   :  { %2055 = vmatpush1.bf16.msra.mxu1 %v2624_v27 }
 0xbe3   :  { %2056 = vmatprep.subr.bf16.mxu1 %v2629_v46 }
 0xbe6   :  { %2057 = vmatpush1.bf16.msra.mxu1 %v2627_v14 }
 0xc50   :  { %v1579_v28 = vpop.xlane.xlu1 %1578 }
 0xc51   :  { %v1583_v29 = vmul.f32 0.00390625, %v1579_v28 }
 0xc52   :  { %v1582_v30 = vpop.xlane.xlu0 %1581 }
 0xc53   :  { %v1585_v31 = vadd.f32 1e-05, %v1583_v29  ;;  %v1584_v32 = vmul.f32 0.00390625, %v1582_v30 }
 0xc55   :  { %2653 = vrsqrt.f32 %v1585_v31  ;;  %v1586_v33 = vadd.f32 1e-05, %v1584_v32 }
 0xc57   :  { %2655 = vrsqrt.f32 %v1586_v33 }
 0xc5f   :  { %v2654_v34 = vpop.eup %2653 }
 0xc60   :  { %v1589_v39 = vmul.f32 %v2654_v34, %v3266_v35  ;;  %v1590_v41 = vmul.f32 %v2654_v34, %v3268_v13  ;;  %v2632_v35 = vld [vmem:[%s3434_s10 + $0xf4] ss:$8 sps:$4 sm:$0xff]   ;;  %v2630_v13 = vld [vmem:[%s3434_s10 + $0xf0] ss:$8 sps:$4 sm:$0xff]   ;;  %s2690_s10 = smov [#allocation2]  }
 0xc61   :  { %v2656_v37 = vpop.eup %2655  ;;  %2058 = vmatprep.subr.bf16.mxu1 %v2632_v35  ;;  %s2112_s23 = sshll.u32 %s2690_s10, 4  ;;  %s2113_s23 = int_to_ptr.vmem [resolvable:$true] %s2112_s23 }
 0xc62   :  { %v1591_v40 = vmul.f32 %v2656_v37, %v3270_v36  ;;  %v1592_v43 = vmul.f32 %v2656_v37, %v3272_v52  ;;  %2059 = vmatpush1.bf16.msra.mxu1 %v2630_v13  ;;  %s2661_s24 = scalar_lea.vmem %s2113_s23, 512  ;;  %p2666_p1 = scmp.lt.s32.totalorder %s2113_s23, %s2113_s23 }
 0xc63   :  { %p2662_p0 = scmp.ne.s32.totalorder %s2113_s23, %s2661_s24  ;;  %p2667_p2 = scmp.lt.s32.totalorder %s2661_s24, %s2661_s24 }
 0xc64   :  { %v1594_v44 = vpack.c.bf16 %v1592_v43, %v1590_v41  ;;  %v1593_v45 = vpack.c.bf16 %v1591_v40, %v1589_v39 }
 0xc65   :  { %p2668_p3 = por %p2667_p2, %p2666_p1 }
 0xc66   :  { %1819 = vmatprep.mubr.bf16.mxu0 %v1594_v44 }
 0xc67   :  { %1820 = vmatmul.mubr.bf16.vlgmr.msra.gmra.mrb[12].mxu0 %v1593_v45  ;;  %p2669_p4 = pnand %p2668_p3, %p2662_p0 }
 0xd3a   :  { %v1821_v36 = vpop.f32.mrb[12].mxu0 }
 0xd3b   :  { %v1823_v52 = vpop.f32.mrb[13].mxu0  ;;  %v1830_v54 = vmax.f32 %v1821_v36, 0.0 }
 0xd3c   :  { %v1825_v53 = vpop.f32.mrb[14].mxu0  ;;  %v1831_v57 = vmax.f32 %v1823_v52, 0.0 }
 0xd3d   :  { %v1832_v55 = vmax.f32 %v1825_v53, 0.0  ;;  %v1827_v56 = vpop.f32.mrb[15].mxu0 }
 0xd3e   :  { %v1833_v58 = vmax.f32 %v1827_v56, 0.0 }
 0xd3f   :  { %v1834_v59 = vpack.c.bf16 %v1832_v55, %v1830_v54 }
 0xd40   :  { %v1835_v60 = vpack.c.bf16 %v1833_v58, %v1831_v57 }
 0xd42   :  { %2060 = vmatprep.mubr.bf16.mxu1 %v1835_v60 }
 0xd43   :  { %2061 = vmatmul.mubr.bf16.vlgmr.msra.gmra.mrb[28].mxu1 %v1834_v59 }
 0xe16   :  { %v2062_v61 = vpop.f32.mrb[28].mxu1 }
 0xe17   :  { %v2063_v42 = vadd.f32 %v2062_v61, %v1589_v39  ;;  %v2064_v62 = vpop.f32.mrb[29].mxu1 }
 0xe18   :  { %v2065_v63 = vadd.f32 %v2064_v62, %v1590_v41  ;;  %v2066_v0 = vpop.f32.mrb[30].mxu1 }
 0xe19   :  { %v2067_v1 = vadd.f32 %v2066_v0, %v1591_v40  ;;  %v2068_v38 = vpop.f32.mrb[31].mxu1 }
 0xe1a   :  { %v2069_v2 = vadd.f32 %v2068_v38, %v1592_v43  ;;  %v2071_v3 = vadd.f32 %v2065_v63, %v2063_v42 }
 0xe1c   :  { %2072 = vadd.xlane.f32.xlu1 %v2071_v3  ;;  %v2074_v4 = vadd.f32 %v2069_v2, %v2067_v1 }
 0xe1e   :  { %2075 = vadd.xlane.f32.xlu0 %v2074_v4 }
 0xea9   :  { %v2073_v47 = vpop.xlane.xlu1 %2072 }
 0xeaa   :  { %v2077_v5 = vmul.f32 0.00390625, %v2073_v47 }
 0xeab   :  { %v2076_v6 = vpop.xlane.xlu0 %2075 }
 0xeac   :  { %v2079_v7 = vsub.f32 %v2063_v42, %v2077_v5  ;;  %v2080_v8 = vsub.f32 %v2065_v63, %v2077_v5  ;;  %v2078_v9 = vmul.f32 0.00390625, %v2076_v6 }
 0xeae   :  { %v2081_v10 = vsub.f32 %v2067_v1, %v2078_v9  ;;  %v2082_v11 = vsub.f32 %v2069_v2, %v2078_v9  ;;  %v2083_v12 = vmul.f32 %v2079_v7, %v2079_v7  ;;  %v2084_v15 = vmul.f32 %v2080_v8, %v2080_v8 }
 0xeb0   :  { %v2087_v16 = vadd.f32 %v2084_v15, %v2083_v12  ;;  %v2085_v17 = vmul.f32 %v2081_v10, %v2081_v10  ;;  %v2086_v18 = vmul.f32 %v2082_v11, %v2082_v11 }
 0xeb2   :  { %2088 = vadd.xlane.f32.xlu1 %v2087_v16  ;;  %v2090_v19 = vadd.f32 %v2086_v18, %v2085_v17 }
 0xeb4   :  { %2091 = vadd.xlane.f32.xlu0 %v2090_v19 }
 0xf3f   :  { %v2089_v20 = vpop.xlane.xlu1 %2088 }
 0xf40   :  { %v2093_v21 = vmul.f32 0.00390625, %v2089_v20 }
 0xf41   :  { %v2092_v22 = vpop.xlane.xlu0 %2091 }
 0xf42   :  { %v2095_v50 = vadd.f32 1e-05, %v2093_v21  ;;  %v2094_v48 = vmul.f32 0.00390625, %v2092_v22 }
 0xf44   :  { %2657 = vrsqrt.f32 %v2095_v50  ;;  %v2096_v49 = vadd.f32 1e-05, %v2094_v48 }
 0xf46   :  { %2659 = vrsqrt.f32 %v2096_v49 }
 0xf4e   :  { %v2658_v51 = vpop.eup %2657 }
 0xf4f   :  { %v2099_v23 = vmul.f32 %v2658_v51, %v2079_v7  ;;  %v2100_v24 = vmul.f32 %v2658_v51, %v2080_v8 }
 0xf50   :  { %v2660_v25 = vpop.eup %2659 }
 0xf51   :  { %2103 = vst [vmem:[#allocation2] sm:$0xff] %v2099_v23  ;;  %2104 = vst [vmem:[#allocation2 + $0x8] sm:$0xff] %v2100_v24  ;;  %v2101_v26 = vmul.f32 %v2660_v25, %v2081_v10  ;;  %v2102_v27 = vmul.f32 %v2660_v25, %v2082_v11 }
 0xf53   :  { %2105 = vst [vmem:[#allocation2 + $0x10] sm:$0xff] %v2101_v26  ;;  %2106 = vst [vmem:[#allocation2 + $0x18] sm:$0xff] %v2102_v27 }
 0xf54   :  { %2672 = shalt.err (!%p2669_p4)
}
 0xf55   :  { %s2673_s26 = scalar_lea.hbm %s3435_s11, 512 }
 0xf56   :  { %p2674_p5 = scmp.ne.s32.totalorder %s3435_s11, %s2673_s26  ;;  %p2677_p6 = scmp.lt.u32.totalorder %s2673_s26, %s3435_s11 }
 0xf58   :  { %p2679_p7 = pnand %p2677_p6, %p2674_p5 }
 0xf5a   :  { %2682 = shalt.err (!%p2679_p7)
}
 0xf5b   :  { %s2691_s5 = smov 256   ;;  %s2692_s12 = smov 16  }
 0xf5c   :  { %2118 = dma.vmem_to_hbm [thread:$0]  %s2113_s23, 512, %s3435_s11, [#allocation3], %s2691_s5, %s2691_s5, %s2692_s12  }
 0xf5d   :  { %2683 = dma.done.wait [#allocation3], 512  }
 0xf5e   :  { %2684 = vsyncadd [#allocation3], 4294966784 }
 0xf5f   :  { %2122 = vsyncpa [#allocation3], 1 }

</bundles_post_ra>
